<compile_context>
chip_gen: v5e
topology: v5e:2x2
jax: 0.10.0
libtpu: 0.0.40
codegen_flags: <defaults>
</compile_context>

<pallas_src>
import functools
import math

import numpy as np

import jax
import jax.numpy as jnp
from jax.experimental import pallas as pl
from jax.experimental.pallas import tpu as pltpu


# --------------------------------------------------------------------------- #
# Fused forward kernel: one batch tile (tb images) per grid step.
# x_ref layout is (h=28, b=tb, w=28) so every row gather is a contiguous slice.
# --------------------------------------------------------------------------- #
def net_fused_kernel(x_ref, t1e_ref, t1o_ref, b1_ref, t2e_ref, t2o_ref, b2_ref,
                     w1p_ref, bf1_ref, w2t_ref, bf2_ref, o_ref, *, tb):
    f32 = jnp.float32

    # ---- conv1 (1->10, k5) as two lane-dense banded matmuls ----------------
    # rows[oh*tb + b, kh*28 + iw] = x[b, oh+kh, iw]          -> [24*tb, 140]
    xv = x_ref[...]                                            # [28, tb, 28]
    rows = jnp.concatenate(
        [xv[kh:kh + 24, :, :].reshape(24 * tb, 28) for kh in range(5)], axis=1)
    bias1 = b1_ref[...]                                        # [1, 120]
    c1e = jnp.dot(rows, t1e_ref[...], preferred_element_type=f32) + bias1
    c1o = jnp.dot(rows, t1o_ref[...], preferred_element_type=f32) + bias1
    # 2x2 width max-pool = even vs odd output-column phase; cols = q*10 + c
    wp1 = jnp.maximum(c1e, c1o)                                # [24*tb, 120]

    # ---- height max-pool + relu: 12 rows of [tb, 120] ----------------------
    a1_rows = [
        jnp.maximum(jnp.maximum(wp1[(2 * h) * tb:(2 * h + 1) * tb, :],
                                wp1[(2 * h + 1) * tb:(2 * h + 2) * tb, :]), 0.0)
        for h in range(12)
    ]

    # ---- conv2 (10->20, k5): in-VMEM im2col over the 5 input rows ----------
    # A2[oh2*tb + b, kh2*120 + w*10 + ci] = a1[b, oh2+kh2, w, ci]
    col_blocks = [
        jnp.concatenate([a1_rows[oh2 + k] for oh2 in range(8)], axis=0)
        for k in range(5)
    ]                                                          # 5 x [8*tb, 120]
    A2 = jnp.concatenate(col_blocks, axis=1)                   # [8*tb, 600]
    bias2 = b2_ref[...]                                        # [1, 80]
    c2e = jnp.dot(A2, t2e_ref[...], preferred_element_type=f32) + bias2
    c2o = jnp.dot(A2, t2o_ref[...], preferred_element_type=f32) + bias2
    m2 = jnp.maximum(c2e, c2o)                                 # width-pooled, [8*tb, 80]
    # Dropout2d: identity (eval mode).

    # ---- height max-pool + relu + flatten (cols = p2*80 + q2*20 + co) ------
    pooled = [
        jnp.maximum(
            jnp.maximum(m2[(2 * p2) * tb:(2 * p2 + 1) * tb, :],
                        m2[(2 * p2 + 1) * tb:(2 * p2 + 2) * tb, :]), 0.0)
        for p2 in range(4)
    ]
    flat = jnp.concatenate(pooled, axis=1)                     # [tb, 320]

    # ---- fc1 + relu + (dropout=identity) + fc2 + log_softmax ---------------
    h = jnp.dot(flat, w1p_ref[...], preferred_element_type=f32) + bf1_ref[...]
    h = jnp.maximum(h, 0.0)
    logits = jnp.dot(h, w2t_ref[...], preferred_element_type=f32) + bf2_ref[...]
    z = logits - jnp.max(logits, axis=-1, keepdims=True)
    o_ref[...] = z - jnp.log(jnp.sum(jnp.exp(z), axis=-1, keepdims=True))


# --------------------------------------------------------------------------- #
# Host-side wrapper
# --------------------------------------------------------------------------- #
def _mosaic_params():
    cls = (getattr(pltpu, "CompilerParams", None)
           or getattr(pltpu, "TPUCompilerParams", None))
    return None if cls is None else cls(dimension_semantics=("parallel",))


def _pick_batch_tile(batch):
    for tb in (32, 16, 8):
        if batch % tb == 0:
            return tb
    return 8


def net_forward(x, kparams):
    """x: NCHW float32 [B, 1, 28, 28] -> log-probs [B, 10]."""
    t1e, t1o, b1t, t2e, t2o, b2t, w1p, bf1, w2t, bf2 = kparams
    B = x.shape[0]
    tb = _pick_batch_tile(B)
    Bp = ((B + tb - 1) // tb) * tb

    # Tiny one-off input reorder to (h, b, w); batch padded to the tile size.
    xb = x.reshape(B, 28, 28).transpose(1, 0, 2)               # [28, B, 28]
    if Bp != B:
        xb = jnp.pad(xb, ((0, 0), (0, Bp - B), (0, 0)))

    wmap = lambda i: (0, 0)
    out = pl.pallas_call(
        functools.partial(net_fused_kernel, tb=tb),
        out_shape=jax.ShapeDtypeStruct((Bp, 10), jnp.float32),
        grid=(Bp // tb,),
        in_specs=[
            pl.BlockSpec((28, tb, 28), lambda i: (0, i, 0)),   # image tile (h,b,w)
            pl.BlockSpec((140, 120), wmap),                    # conv1 banded W (even)
            pl.BlockSpec((140, 120), wmap),                    # conv1 banded W (odd)
            pl.BlockSpec((1, 120), wmap),                      # conv1 bias (tiled)
            pl.BlockSpec((600, 80), wmap),                     # conv2 banded W (even)
            pl.BlockSpec((600, 80), wmap),                     # conv2 banded W (odd)
            pl.BlockSpec((1, 80), wmap),                       # conv2 bias (tiled)
            pl.BlockSpec((320, 50), wmap),                     # fc1 weight (permuted)
            pl.BlockSpec((1, 50), wmap),                       # fc1 bias
            pl.BlockSpec((50, 10), wmap),                      # fc2 weight
            pl.BlockSpec((1, 10), wmap),                       # fc2 bias
        ],
        out_specs=pl.BlockSpec((tb, 10), lambda i: (i, 0)),
        compiler_params=_mosaic_params(),
    )(xb, t1e, t1o, b1t, t2e, t2o, b2t, w1p, bf1, w2t, bf2)
    return out[:B]


# --------------------------------------------------------------------------- #
# Parameters
# --------------------------------------------------------------------------- #
def init_params():
    """Deterministic PyTorch-style uniform(-1/sqrt(fan_in), 1/sqrt(fan_in))."""
    key = jax.random.PRNGKey(42)
    ks = jax.random.split(key, 8)

    def u(k, shape, fan_in):
        b = 1.0 / math.sqrt(fan_in)
        return jax.random.uniform(k, shape, jnp.float32, -b, b)

    w1 = u(ks[0], (10, 1, 5, 5), 25)
    b1 = u(ks[1], (10,), 25)
    w2 = u(ks[2], (20, 10, 5, 5), 250)
    b2 = u(ks[3], (20,), 250)
    fw1 = u(ks[4], (50, 320), 320)
    fb1 = u(ks[5], (50,), 320)
    fw2 = u(ks[6], (10, 50), 50)
    fb2 = u(ks[7], (10,), 50)
    return (w1, b1, w2, b2, fw1, fb1, fw2, fb2)


def prepare_kernel_params(params):
    """One-time host prep: banded conv weights + permuted fc1 weight."""
    w1, b1, w2, b2, fw1, fb1, fw2, fb2 = [np.asarray(p, np.float32) for p in params]

    # conv1: rows[.., kh*28+iw] @ T1[kh*28+iw, q*10+co], output col ow = 2q (+1)
    t1e = np.zeros((140, 120), np.float32)
    t1o = np.zeros((140, 120), np.float32)
    for kh in range(5):
        for q in range(12):
            for kw in range(5):
                t1e[kh * 28 + 2 * q + kw, q * 10:(q + 1) * 10] = w1[:, 0, kh, kw]
                t1o[kh * 28 + 2 * q + 1 + kw, q * 10:(q + 1) * 10] = w1[:, 0, kh, kw]
    b1t = np.tile(b1, 12).reshape(1, 120).astype(np.float32)

    # conv2: A2[.., kh2*120 + w*10 + ci] @ T2[.., q2*20 + co], output ow2 = 2q2 (+1)
    t2e = np.zeros((600, 80), np.float32)
    t2o = np.zeros((600, 80), np.float32)
    for kh2 in range(5):
        for q2 in range(4):
            for kw2 in range(5):
                we = 2 * q2 + kw2
                wo = 2 * q2 + 1 + kw2
                for ci in range(10):
                    t2e[kh2 * 120 + we * 10 + ci, q2 * 20:(q2 + 1) * 20] = w2[:, ci, kh2, kw2]
                    t2o[kh2 * 120 + wo * 10 + ci, q2 * 20:(q2 + 1) * 20] = w2[:, ci, kh2, kw2]
    b2t = np.tile(b2, 4).reshape(1, 80).astype(np.float32)

    # fc1: kernel flat col = p2*80 + q2*20 + co  <->  torch col = co*16 + p2*4 + q2
    perm = np.zeros(320, np.int64)
    for p2 in range(4):
        for q2 in range(4):
            for co in range(20):
                perm[p2 * 80 + q2 * 20 + co] = co * 16 + p2 * 4 + q2
    w1p = fw1.T[perm, :].astype(np.float32)          # [320, 50]
    bf1 = fb1.reshape(1, 50).astype(np.float32)
    w2t = fw2.T.astype(np.float32)                   # [50, 10]
    bf2 = fb2.reshape(1, 10).astype(np.float32)

    return tuple(jnp.asarray(a) for a in
                 (t1e, t1o, b1t, t2e, t2o, b2t, w1p, bf1, w2t, bf2))


# --------------------------------------------------------------------------- #
# Pure-JAX reference (for validating the fused kernel)
# --------------------------------------------------------------------------- #
def net_reference(x, params):
    w1, b1, w2, b2, fw1, fb1, fw2, fb2 = params
    B = x.shape[0]
    dn = ("NCHW", "OIHW", "NCHW")
    c1 = jax.lax.conv_general_dilated(x, w1, (1, 1), "VALID", dimension_numbers=dn)
    c1 = c1 + b1[None, :, None, None]
    a1 = jnp.maximum(c1.reshape(B, 10, 12, 2, 12, 2).max(axis=(3, 5)), 0.0)
    c2 = jax.lax.conv_general_dilated(a1, w2, (1, 1), "VALID", dimension_numbers=dn)
    c2 = c2 + b2[None, :, None, None]
    a2 = jnp.maximum(c2.reshape(B, 20, 4, 2, 4, 2).max(axis=(3, 5)), 0.0)
    flat = a2.reshape(B, 320)
    h = jnp.maximum(flat @ fw1.T + fb1, 0.0)
    logits = h @ fw2.T + fb2
    return jax.nn.log_softmax(logits, axis=1)


# --------------------------------------------------------------------------- #
if __name__ == "__main__":
    params = init_params()
    kparams = prepare_kernel_params(params)

    x = jax.random.normal(jax.random.PRNGKey(0), (2, 1, 28, 28), jnp.float32)

    fwd = jax.jit(lambda xx: net_forward(xx, kparams))
    out = jax.block_until_ready(fwd(x))

    assert out.shape == (2, 10), out.shape
    assert out.dtype == jnp.float32
    lse = jax.nn.logsumexp(out, axis=1)
    assert bool(jnp.all(jnp.abs(lse) < 1e-3)), lse
    assert bool(jnp.all(jnp.isfinite(out)))

    ref = jax.block_until_ready(jax.jit(lambda xx: net_reference(xx, params))(x))
    max_err = float(jnp.max(jnp.abs(out - ref)))
    assert max_err < 0.2, max_err  # loose bound: default-precision MXU matmuls

    print("KERNEL_OK")
</pallas_src>

<mosaic_0001>
module attributes {stable_mosaic.version = 11 : i64} {
  func.func @net_fused_kernel(%arg0: i32, %arg1: memref<28x8x28xf32, #tpu.memory_space<vmem>>, %arg2: memref<140x120xf32, #tpu.memory_space<vmem>>, %arg3: memref<140x120xf32, #tpu.memory_space<vmem>>, %arg4: memref<1x120xf32, #tpu.memory_space<vmem>>, %arg5: memref<600x80xf32, #tpu.memory_space<vmem>>, %arg6: memref<600x80xf32, #tpu.memory_space<vmem>>, %arg7: memref<1x80xf32, #tpu.memory_space<vmem>>, %arg8: memref<320x50xf32, #tpu.memory_space<vmem>>, %arg9: memref<1x50xf32, #tpu.memory_space<vmem>>, %arg10: memref<50x10xf32, #tpu.memory_space<vmem>>, %arg11: memref<1x10xf32, #tpu.memory_space<vmem>>, %arg12: memref<8x10xf32, #tpu.memory_space<vmem>>) attributes {dimension_semantics = [#tpu.dimension_semantics<parallel>], iteration_bounds = array<i64: 1>, scalar_prefetch = 0 : i64, scratch_operands = 0 : i64, tpu.core_type = #tpu.core_type<tc>, window_params = [{transform_indices = @transform_0, window_bounds = array<i64: 28, 8, 28>}, {pipeline_mode = #tpu.pipeline_mode<synchronous>, transform_indices = @transform_1, window_bounds = array<i64: 140, 120>}, {pipeline_mode = #tpu.pipeline_mode<synchronous>, transform_indices = @transform_2, window_bounds = array<i64: 140, 120>}, {pipeline_mode = #tpu.pipeline_mode<synchronous>, transform_indices = @transform_3, window_bounds = array<i64: 1, 120>}, {pipeline_mode = #tpu.pipeline_mode<synchronous>, transform_indices = @transform_4, window_bounds = array<i64: 600, 80>}, {pipeline_mode = #tpu.pipeline_mode<synchronous>, transform_indices = @transform_5, window_bounds = array<i64: 600, 80>}, {pipeline_mode = #tpu.pipeline_mode<synchronous>, transform_indices = @transform_6, window_bounds = array<i64: 1, 80>}, {pipeline_mode = #tpu.pipeline_mode<synchronous>, transform_indices = @transform_7, window_bounds = array<i64: 320, 50>}, {pipeline_mode = #tpu.pipeline_mode<synchronous>, transform_indices = @transform_8, window_bounds = array<i64: 1, 50>}, {pipeline_mode = #tpu.pipeline_mode<synchronous>, transform_indices = @transform_9, window_bounds = array<i64: 50, 10>}, {pipeline_mode = #tpu.pipeline_mode<synchronous>, transform_indices = @transform_10, window_bounds = array<i64: 1, 10>}, {transform_indices = @transform_11, window_bounds = array<i64: 8, 10>}]} {
    %c0 = arith.constant 0 : index
    %c0_0 = arith.constant 0 : index
    %c0_1 = arith.constant 0 : index
    %0 = vector.load %arg1[%c0, %c0_0, %c0_1] : memref<28x8x28xf32, #tpu.memory_space<vmem>>, vector<28x8x28xf32>
    %1 = vector.extract_strided_slice %0 {offsets = [0, 0, 0], sizes = [24, 8, 28], strides = [1, 1, 1]} : vector<28x8x28xf32> to vector<24x8x28xf32>
    %2 = vector.shape_cast %1 : vector<24x8x28xf32> to vector<192x28xf32>
    %3 = vector.extract_strided_slice %0 {offsets = [1, 0, 0], sizes = [24, 8, 28], strides = [1, 1, 1]} : vector<28x8x28xf32> to vector<24x8x28xf32>
    %4 = vector.shape_cast %3 : vector<24x8x28xf32> to vector<192x28xf32>
    %5 = vector.extract_strided_slice %0 {offsets = [2, 0, 0], sizes = [24, 8, 28], strides = [1, 1, 1]} : vector<28x8x28xf32> to vector<24x8x28xf32>
    %6 = vector.shape_cast %5 : vector<24x8x28xf32> to vector<192x28xf32>
    %7 = vector.extract_strided_slice %0 {offsets = [3, 0, 0], sizes = [24, 8, 28], strides = [1, 1, 1]} : vector<28x8x28xf32> to vector<24x8x28xf32>
    %8 = vector.shape_cast %7 : vector<24x8x28xf32> to vector<192x28xf32>
    %9 = vector.extract_strided_slice %0 {offsets = [4, 0, 0], sizes = [24, 8, 28], strides = [1, 1, 1]} : vector<28x8x28xf32> to vector<24x8x28xf32>
    %10 = vector.shape_cast %9 : vector<24x8x28xf32> to vector<192x28xf32>
    %11 = tpu.concatenate %2, %4, %6, %8, %10 in 1 : vector<192x28xf32>, vector<192x28xf32>, vector<192x28xf32>, vector<192x28xf32>, vector<192x28xf32> -> vector<192x140xf32>
    %c0_2 = arith.constant 0 : index
    %c0_3 = arith.constant 0 : index
    %12 = vector.load %arg4[%c0_2, %c0_3] : memref<1x120xf32, #tpu.memory_space<vmem>>, vector<1x120xf32>
    %c0_4 = arith.constant 0 : index
    %c0_5 = arith.constant 0 : index
    %13 = vector.load %arg2[%c0_4, %c0_5] : memref<140x120xf32, #tpu.memory_space<vmem>>, vector<140x120xf32>
    %cst = arith.constant dense<0.000000e+00> : vector<192x120xf32>
    %14 = tpu.matmul %11, %13, %cst {dimension_numbers = #tpu.dot_dimension_numbers<[1], [0], [0], [1], [0, 0, 1, 1], [], []>} : vector<192x140xf32>, vector<140x120xf32>, vector<192x120xf32> -> vector<192x120xf32>
    %15 = vector.broadcast %12 : vector<1x120xf32> to vector<192x120xf32>
    %16 = arith.addf %14, %15 : vector<192x120xf32>
    %c0_6 = arith.constant 0 : index
    %c0_7 = arith.constant 0 : index
    %17 = vector.load %arg3[%c0_6, %c0_7] : memref<140x120xf32, #tpu.memory_space<vmem>>, vector<140x120xf32>
    %cst_8 = arith.constant dense<0.000000e+00> : vector<192x120xf32>
    %18 = tpu.matmul %11, %17, %cst_8 {dimension_numbers = #tpu.dot_dimension_numbers<[1], [0], [0], [1], [0, 0, 1, 1], [], []>} : vector<192x140xf32>, vector<140x120xf32>, vector<192x120xf32> -> vector<192x120xf32>
    %19 = vector.broadcast %12 : vector<1x120xf32> to vector<192x120xf32>
    %20 = arith.addf %18, %19 : vector<192x120xf32>
    %21 = arith.maximumf %16, %20 : vector<192x120xf32>
    %22 = vector.extract_strided_slice %21 {offsets = [0, 0], sizes = [8, 120], strides = [1, 1]} : vector<192x120xf32> to vector<8x120xf32>
    %23 = vector.extract_strided_slice %21 {offsets = [8, 0], sizes = [8, 120], strides = [1, 1]} : vector<192x120xf32> to vector<8x120xf32>
    %24 = arith.maximumf %22, %23 : vector<8x120xf32>
    %cst_9 = arith.constant 0.000000e+00 : f32
    %25 = vector.broadcast %cst_9 : f32 to vector<8x120xf32>
    %26 = arith.maximumf %24, %25 : vector<8x120xf32>
    %27 = vector.extract_strided_slice %21 {offsets = [16, 0], sizes = [8, 120], strides = [1, 1]} : vector<192x120xf32> to vector<8x120xf32>
    %28 = vector.extract_strided_slice %21 {offsets = [24, 0], sizes = [8, 120], strides = [1, 1]} : vector<192x120xf32> to vector<8x120xf32>
    %29 = arith.maximumf %27, %28 : vector<8x120xf32>
    %cst_10 = arith.constant 0.000000e+00 : f32
    %30 = vector.broadcast %cst_10 : f32 to vector<8x120xf32>
    %31 = arith.maximumf %29, %30 : vector<8x120xf32>
    %32 = vector.extract_strided_slice %21 {offsets = [32, 0], sizes = [8, 120], strides = [1, 1]} : vector<192x120xf32> to vector<8x120xf32>
    %33 = vector.extract_strided_slice %21 {offsets = [40, 0], sizes = [8, 120], strides = [1, 1]} : vector<192x120xf32> to vector<8x120xf32>
    %34 = arith.maximumf %32, %33 : vector<8x120xf32>
    %cst_11 = arith.constant 0.000000e+00 : f32
    %35 = vector.broadcast %cst_11 : f32 to vector<8x120xf32>
    %36 = arith.maximumf %34, %35 : vector<8x120xf32>
    %37 = vector.extract_strided_slice %21 {offsets = [48, 0], sizes = [8, 120], strides = [1, 1]} : vector<192x120xf32> to vector<8x120xf32>
    %38 = vector.extract_strided_slice %21 {offsets = [56, 0], sizes = [8, 120], strides = [1, 1]} : vector<192x120xf32> to vector<8x120xf32>
    %39 = arith.maximumf %37, %38 : vector<8x120xf32>
    %cst_12 = arith.constant 0.000000e+00 : f32
    %40 = vector.broadcast %cst_12 : f32 to vector<8x120xf32>
    %41 = arith.maximumf %39, %40 : vector<8x120xf32>
    %42 = vector.extract_strided_slice %21 {offsets = [64, 0], sizes = [8, 120], strides = [1, 1]} : vector<192x120xf32> to vector<8x120xf32>
    %43 = vector.extract_strided_slice %21 {offsets = [72, 0], sizes = [8, 120], strides = [1, 1]} : vector<192x120xf32> to vector<8x120xf32>
    %44 = arith.maximumf %42, %43 : vector<8x120xf32>
    %cst_13 = arith.constant 0.000000e+00 : f32
    %45 = vector.broadcast %cst_13 : f32 to vector<8x120xf32>
    %46 = arith.maximumf %44, %45 : vector<8x120xf32>
    %47 = vector.extract_strided_slice %21 {offsets = [80, 0], sizes = [8, 120], strides = [1, 1]} : vector<192x120xf32> to vector<8x120xf32>
    %48 = vector.extract_strided_slice %21 {offsets = [88, 0], sizes = [8, 120], strides = [1, 1]} : vector<192x120xf32> to vector<8x120xf32>
    %49 = arith.maximumf %47, %48 : vector<8x120xf32>
    %cst_14 = arith.constant 0.000000e+00 : f32
    %50 = vector.broadcast %cst_14 : f32 to vector<8x120xf32>
    %51 = arith.maximumf %49, %50 : vector<8x120xf32>
    %52 = vector.extract_strided_slice %21 {offsets = [96, 0], sizes = [8, 120], strides = [1, 1]} : vector<192x120xf32> to vector<8x120xf32>
    %53 = vector.extract_strided_slice %21 {offsets = [104, 0], sizes = [8, 120], strides = [1, 1]} : vector<192x120xf32> to vector<8x120xf32>
    %54 = arith.maximumf %52, %53 : vector<8x120xf32>
    %cst_15 = arith.constant 0.000000e+00 : f32
    %55 = vector.broadcast %cst_15 : f32 to vector<8x120xf32>
    %56 = arith.maximumf %54, %55 : vector<8x120xf32>
    %57 = vector.extract_strided_slice %21 {offsets = [112, 0], sizes = [8, 120], strides = [1, 1]} : vector<192x120xf32> to vector<8x120xf32>
    %58 = vector.extract_strided_slice %21 {offsets = [120, 0], sizes = [8, 120], strides = [1, 1]} : vector<192x120xf32> to vector<8x120xf32>
    %59 = arith.maximumf %57, %58 : vector<8x120xf32>
    %cst_16 = arith.constant 0.000000e+00 : f32
    %60 = vector.broadcast %cst_16 : f32 to vector<8x120xf32>
    %61 = arith.maximumf %59, %60 : vector<8x120xf32>
    %62 = vector.extract_strided_slice %21 {offsets = [128, 0], sizes = [8, 120], strides = [1, 1]} : vector<192x120xf32> to vector<8x120xf32>
    %63 = vector.extract_strided_slice %21 {offsets = [136, 0], sizes = [8, 120], strides = [1, 1]} : vector<192x120xf32> to vector<8x120xf32>
    %64 = arith.maximumf %62, %63 : vector<8x120xf32>
    %cst_17 = arith.constant 0.000000e+00 : f32
    %65 = vector.broadcast %cst_17 : f32 to vector<8x120xf32>
    %66 = arith.maximumf %64, %65 : vector<8x120xf32>
    %67 = vector.extract_strided_slice %21 {offsets = [144, 0], sizes = [8, 120], strides = [1, 1]} : vector<192x120xf32> to vector<8x120xf32>
    %68 = vector.extract_strided_slice %21 {offsets = [152, 0], sizes = [8, 120], strides = [1, 1]} : vector<192x120xf32> to vector<8x120xf32>
    %69 = arith.maximumf %67, %68 : vector<8x120xf32>
    %cst_18 = arith.constant 0.000000e+00 : f32
    %70 = vector.broadcast %cst_18 : f32 to vector<8x120xf32>
    %71 = arith.maximumf %69, %70 : vector<8x120xf32>
    %72 = vector.extract_strided_slice %21 {offsets = [160, 0], sizes = [8, 120], strides = [1, 1]} : vector<192x120xf32> to vector<8x120xf32>
    %73 = vector.extract_strided_slice %21 {offsets = [168, 0], sizes = [8, 120], strides = [1, 1]} : vector<192x120xf32> to vector<8x120xf32>
    %74 = arith.maximumf %72, %73 : vector<8x120xf32>
    %cst_19 = arith.constant 0.000000e+00 : f32
    %75 = vector.broadcast %cst_19 : f32 to vector<8x120xf32>
    %76 = arith.maximumf %74, %75 : vector<8x120xf32>
    %77 = vector.extract_strided_slice %21 {offsets = [176, 0], sizes = [8, 120], strides = [1, 1]} : vector<192x120xf32> to vector<8x120xf32>
    %78 = vector.extract_strided_slice %21 {offsets = [184, 0], sizes = [8, 120], strides = [1, 1]} : vector<192x120xf32> to vector<8x120xf32>
    %79 = arith.maximumf %77, %78 : vector<8x120xf32>
    %cst_20 = arith.constant 0.000000e+00 : f32
    %80 = vector.broadcast %cst_20 : f32 to vector<8x120xf32>
    %81 = arith.maximumf %79, %80 : vector<8x120xf32>
    %82 = tpu.concatenate %26, %31, %36, %41, %46, %51, %56, %61 in 0 : vector<8x120xf32>, vector<8x120xf32>, vector<8x120xf32>, vector<8x120xf32>, vector<8x120xf32>, vector<8x120xf32>, vector<8x120xf32>, vector<8x120xf32> -> vector<64x120xf32>
    %83 = tpu.concatenate %31, %36, %41, %46, %51, %56, %61, %66 in 0 : vector<8x120xf32>, vector<8x120xf32>, vector<8x120xf32>, vector<8x120xf32>, vector<8x120xf32>, vector<8x120xf32>, vector<8x120xf32>, vector<8x120xf32> -> vector<64x120xf32>
    %84 = tpu.concatenate %36, %41, %46, %51, %56, %61, %66, %71 in 0 : vector<8x120xf32>, vector<8x120xf32>, vector<8x120xf32>, vector<8x120xf32>, vector<8x120xf32>, vector<8x120xf32>, vector<8x120xf32>, vector<8x120xf32> -> vector<64x120xf32>
    %85 = tpu.concatenate %41, %46, %51, %56, %61, %66, %71, %76 in 0 : vector<8x120xf32>, vector<8x120xf32>, vector<8x120xf32>, vector<8x120xf32>, vector<8x120xf32>, vector<8x120xf32>, vector<8x120xf32>, vector<8x120xf32> -> vector<64x120xf32>
    %86 = tpu.concatenate %46, %51, %56, %61, %66, %71, %76, %81 in 0 : vector<8x120xf32>, vector<8x120xf32>, vector<8x120xf32>, vector<8x120xf32>, vector<8x120xf32>, vector<8x120xf32>, vector<8x120xf32>, vector<8x120xf32> -> vector<64x120xf32>
    %87 = tpu.concatenate %82, %83, %84, %85, %86 in 1 : vector<64x120xf32>, vector<64x120xf32>, vector<64x120xf32>, vector<64x120xf32>, vector<64x120xf32> -> vector<64x600xf32>
    %c0_21 = arith.constant 0 : index
    %c0_22 = arith.constant 0 : index
    %88 = vector.load %arg7[%c0_21, %c0_22] : memref<1x80xf32, #tpu.memory_space<vmem>>, vector<1x80xf32>
    %c0_23 = arith.constant 0 : index
    %c0_24 = arith.constant 0 : index
    %89 = vector.load %arg5[%c0_23, %c0_24] : memref<600x80xf32, #tpu.memory_space<vmem>>, vector<600x80xf32>
    %cst_25 = arith.constant dense<0.000000e+00> : vector<64x80xf32>
    %90 = tpu.matmul %87, %89, %cst_25 {dimension_numbers = #tpu.dot_dimension_numbers<[1], [0], [0], [1], [0, 0, 1, 1], [], []>} : vector<64x600xf32>, vector<600x80xf32>, vector<64x80xf32> -> vector<64x80xf32>
    %91 = vector.broadcast %88 : vector<1x80xf32> to vector<64x80xf32>
    %92 = arith.addf %90, %91 : vector<64x80xf32>
    %c0_26 = arith.constant 0 : index
    %c0_27 = arith.constant 0 : index
    %93 = vector.load %arg6[%c0_26, %c0_27] : memref<600x80xf32, #tpu.memory_space<vmem>>, vector<600x80xf32>
    %cst_28 = arith.constant dense<0.000000e+00> : vector<64x80xf32>
    %94 = tpu.matmul %87, %93, %cst_28 {dimension_numbers = #tpu.dot_dimension_numbers<[1], [0], [0], [1], [0, 0, 1, 1], [], []>} : vector<64x600xf32>, vector<600x80xf32>, vector<64x80xf32> -> vector<64x80xf32>
    %95 = vector.broadcast %88 : vector<1x80xf32> to vector<64x80xf32>
    %96 = arith.addf %94, %95 : vector<64x80xf32>
    %97 = arith.maximumf %92, %96 : vector<64x80xf32>
    %98 = vector.extract_strided_slice %97 {offsets = [0, 0], sizes = [8, 80], strides = [1, 1]} : vector<64x80xf32> to vector<8x80xf32>
    %99 = vector.extract_strided_slice %97 {offsets = [8, 0], sizes = [8, 80], strides = [1, 1]} : vector<64x80xf32> to vector<8x80xf32>
    %100 = arith.maximumf %98, %99 : vector<8x80xf32>
    %cst_29 = arith.constant 0.000000e+00 : f32
    %101 = vector.broadcast %cst_29 : f32 to vector<8x80xf32>
    %102 = arith.maximumf %100, %101 : vector<8x80xf32>
    %103 = vector.extract_strided_slice %97 {offsets = [16, 0], sizes = [8, 80], strides = [1, 1]} : vector<64x80xf32> to vector<8x80xf32>
    %104 = vector.extract_strided_slice %97 {offsets = [24, 0], sizes = [8, 80], strides = [1, 1]} : vector<64x80xf32> to vector<8x80xf32>
    %105 = arith.maximumf %103, %104 : vector<8x80xf32>
    %cst_30 = arith.constant 0.000000e+00 : f32
    %106 = vector.broadcast %cst_30 : f32 to vector<8x80xf32>
    %107 = arith.maximumf %105, %106 : vector<8x80xf32>
    %108 = vector.extract_strided_slice %97 {offsets = [32, 0], sizes = [8, 80], strides = [1, 1]} : vector<64x80xf32> to vector<8x80xf32>
    %109 = vector.extract_strided_slice %97 {offsets = [40, 0], sizes = [8, 80], strides = [1, 1]} : vector<64x80xf32> to vector<8x80xf32>
    %110 = arith.maximumf %108, %109 : vector<8x80xf32>
    %cst_31 = arith.constant 0.000000e+00 : f32
    %111 = vector.broadcast %cst_31 : f32 to vector<8x80xf32>
    %112 = arith.maximumf %110, %111 : vector<8x80xf32>
    %113 = vector.extract_strided_slice %97 {offsets = [48, 0], sizes = [8, 80], strides = [1, 1]} : vector<64x80xf32> to vector<8x80xf32>
    %114 = vector.extract_strided_slice %97 {offsets = [56, 0], sizes = [8, 80], strides = [1, 1]} : vector<64x80xf32> to vector<8x80xf32>
    %115 = arith.maximumf %113, %114 : vector<8x80xf32>
    %cst_32 = arith.constant 0.000000e+00 : f32
    %116 = vector.broadcast %cst_32 : f32 to vector<8x80xf32>
    %117 = arith.maximumf %115, %116 : vector<8x80xf32>
    %118 = tpu.concatenate %102, %107, %112, %117 in 1 : vector<8x80xf32>, vector<8x80xf32>, vector<8x80xf32>, vector<8x80xf32> -> vector<8x320xf32>
    %c0_33 = arith.constant 0 : index
    %c0_34 = arith.constant 0 : index
    %119 = vector.load %arg8[%c0_33, %c0_34] : memref<320x50xf32, #tpu.memory_space<vmem>>, vector<320x50xf32>
    %cst_35 = arith.constant dense<0.000000e+00> : vector<8x50xf32>
    %120 = tpu.matmul %118, %119, %cst_35 {dimension_numbers = #tpu.dot_dimension_numbers<[1], [0], [0], [1], [0, 0, 1, 1], [], []>} : vector<8x320xf32>, vector<320x50xf32>, vector<8x50xf32> -> vector<8x50xf32>
    %c0_36 = arith.constant 0 : index
    %c0_37 = arith.constant 0 : index
    %121 = vector.load %arg9[%c0_36, %c0_37] : memref<1x50xf32, #tpu.memory_space<vmem>>, vector<1x50xf32>
    %122 = vector.broadcast %121 : vector<1x50xf32> to vector<8x50xf32>
    %123 = arith.addf %120, %122 : vector<8x50xf32>
    %cst_38 = arith.constant 0.000000e+00 : f32
    %124 = vector.broadcast %cst_38 : f32 to vector<8x50xf32>
    %125 = arith.maximumf %123, %124 : vector<8x50xf32>
    %c0_39 = arith.constant 0 : index
    %c0_40 = arith.constant 0 : index
    %126 = vector.load %arg10[%c0_39, %c0_40] : memref<50x10xf32, #tpu.memory_space<vmem>>, vector<50x10xf32>
    %cst_41 = arith.constant dense<0.000000e+00> : vector<8x10xf32>
    %127 = tpu.matmul %125, %126, %cst_41 {dimension_numbers = #tpu.dot_dimension_numbers<[1], [0], [0], [1], [0, 0, 1, 1], [], []>} : vector<8x50xf32>, vector<50x10xf32>, vector<8x10xf32> -> vector<8x10xf32>
    %c0_42 = arith.constant 0 : index
    %c0_43 = arith.constant 0 : index
    %128 = vector.load %arg11[%c0_42, %c0_43] : memref<1x10xf32, #tpu.memory_space<vmem>>, vector<1x10xf32>
    %129 = vector.broadcast %128 : vector<1x10xf32> to vector<8x10xf32>
    %130 = arith.addf %127, %129 : vector<8x10xf32>
    %cst_44 = arith.constant dense<0xFF800000> : vector<8xf32>
    %131 = vector.multi_reduction <maximumf>, %130, %cst_44 [1] : vector<8x10xf32> to vector<8xf32>
    %132 = vector.shape_cast %131 : vector<8xf32> to vector<8x1xf32>
    %133 = vector.broadcast %132 : vector<8x1xf32> to vector<8x10xf32>
    %134 = arith.subf %130, %133 : vector<8x10xf32>
    %135 = math.exp %134 : vector<8x10xf32>
    %cst_45 = arith.constant dense<0.000000e+00> : vector<8xf32>
    %136 = vector.multi_reduction <add>, %135, %cst_45 [1] : vector<8x10xf32> to vector<8xf32>
    %137 = vector.shape_cast %136 : vector<8xf32> to vector<8x1xf32>
    %138 = math.log %137 : vector<8x1xf32>
    %139 = vector.broadcast %138 : vector<8x1xf32> to vector<8x10xf32>
    %140 = arith.subf %134, %139 : vector<8x10xf32>
    %c0_46 = arith.constant 0 : index
    %c0_47 = arith.constant 0 : index
    %141 = vector.load %arg12[%c0_46, %c0_47] : memref<8x10xf32, #tpu.memory_space<vmem>>, vector<8x10xf32>
    tpu.vector_store %arg12[%c0_46, %c0_47], %140 {strides = array<i32>} : memref<8x10xf32, #tpu.memory_space<vmem>>, vector<8x10xf32>,
    return
  }
  func.func @transform_0(%arg0: i32) -> (i32, i32, i32) {
    %c0_i32 = arith.constant 0 : i32
    %c0_i32_0 = arith.constant 0 : i32
    %c0_i32_1 = arith.constant 0 : i32
    return %c0_i32, %arg0, %c0_i32_0 : i32, i32, i32
  }
  func.func @transform_1(%arg0: i32) -> (i32, i32) {
    %c0_i32 = arith.constant 0 : i32
    %c0_i32_0 = arith.constant 0 : i32
    %c0_i32_1 = arith.constant 0 : i32
    return %c0_i32, %c0_i32_0 : i32, i32
  }
  func.func @transform_2(%arg0: i32) -> (i32, i32) {
    %c0_i32 = arith.constant 0 : i32
    %c0_i32_0 = arith.constant 0 : i32
    %c0_i32_1 = arith.constant 0 : i32
    return %c0_i32, %c0_i32_0 : i32, i32
  }
  func.func @transform_3(%arg0: i32) -> (i32, i32) {
    %c0_i32 = arith.constant 0 : i32
    %c0_i32_0 = arith.constant 0 : i32
    %c0_i32_1 = arith.constant 0 : i32
    return %c0_i32, %c0_i32_0 : i32, i32
  }
  func.func @transform_4(%arg0: i32) -> (i32, i32) {
    %c0_i32 = arith.constant 0 : i32
    %c0_i32_0 = arith.constant 0 : i32
    %c0_i32_1 = arith.constant 0 : i32
    return %c0_i32, %c0_i32_0 : i32, i32
  }
  func.func @transform_5(%arg0: i32) -> (i32, i32) {
    %c0_i32 = arith.constant 0 : i32
    %c0_i32_0 = arith.constant 0 : i32
    %c0_i32_1 = arith.constant 0 : i32
    return %c0_i32, %c0_i32_0 : i32, i32
  }
  func.func @transform_6(%arg0: i32) -> (i32, i32) {
    %c0_i32 = arith.constant 0 : i32
    %c0_i32_0 = arith.constant 0 : i32
    %c0_i32_1 = arith.constant 0 : i32
    return %c0_i32, %c0_i32_0 : i32, i32
  }
  func.func @transform_7(%arg0: i32) -> (i32, i32) {
    %c0_i32 = arith.constant 0 : i32
    %c0_i32_0 = arith.constant 0 : i32
    %c0_i32_1 = arith.constant 0 : i32
    return %c0_i32, %c0_i32_0 : i32, i32
  }
  func.func @transform_8(%arg0: i32) -> (i32, i32) {
    %c0_i32 = arith.constant 0 : i32
    %c0_i32_0 = arith.constant 0 : i32
    %c0_i32_1 = arith.constant 0 : i32
    return %c0_i32, %c0_i32_0 : i32, i32
  }
  func.func @transform_9(%arg0: i32) -> (i32, i32) {
    %c0_i32 = arith.constant 0 : i32
    %c0_i32_0 = arith.constant 0 : i32
    %c0_i32_1 = arith.constant 0 : i32
    return %c0_i32, %c0_i32_0 : i32, i32
  }
  func.func @transform_10(%arg0: i32) -> (i32, i32) {
    %c0_i32 = arith.constant 0 : i32
    %c0_i32_0 = arith.constant 0 : i32
    %c0_i32_1 = arith.constant 0 : i32
    return %c0_i32, %c0_i32_0 : i32, i32
  }
  func.func @transform_11(%arg0: i32) -> (i32, i32) {
    %c0_i32 = arith.constant 0 : i32
    %c0_i32_0 = arith.constant 0 : i32
    return %arg0, %c0_i32 : i32, i32
  }
}

</mosaic_0001>

<bundles_post_ra>
// kernel: _lambda_.1
= control target key start
LH: loop header
LB: loop body
LE: loop exit
PB: predicated region body
PF: predicated region fallthrough
CT: control target
= control target key end

     0   :  { %16 = vsyncpa [#allocation3], 0  ;;  %s3467_s0 = inlined_call_operand.vmem [shape: f32[28,8,28], index: 0, kind: input, shape index: {}]   ;;  %s3468_s1 = inlined_call_operand.hbm [shape: f32[140,120], index: 1, kind: input, shape index: {}]   ;;  %s3469_s2 = inlined_call_operand.hbm [shape: f32[140,120], index: 2, kind: input, shape index: {}]   ;;  %s3470_s3 = inlined_call_operand.vmem [shape: f32[1,120], index: 3, kind: input, shape index: {}]   ;;  %s3471_s4 = inlined_call_operand.hbm [shape: f32[600,80], index: 4, kind: input, shape index: {}]   ;;  %s3472_s5 = inlined_call_operand.hbm [shape: f32[600,80], index: 5, kind: input, shape index: {}]   ;;  %s3473_s6 = inlined_call_operand.vmem [shape: f32[1,80], index: 6, kind: input, shape index: {}]   ;;  %s3474_s7 = inlined_call_operand.vmem [shape: f32[320,50], index: 7, kind: input, shape index: {}]   ;;  %s3475_s8 = inlined_call_operand.vmem [shape: f32[1,50], index: 8, kind: input, shape index: {}]   ;;  %s3476_s9 = inlined_call_operand.vmem [shape: f32[50,10], index: 9, kind: input, shape index: {}]   ;;  %s3477_s10 = inlined_call_operand.vmem [shape: f32[1,10], index: 10, kind: input, shape index: {}]   ;;  %s3478_s11 = inlined_call_operand.vmem [shape: f32[8,10], index: 11, kind: output, shape index: {}]  }
   0x1   :  { %17 = vsyncpa [#allocation5], 0 }
   0x2   :  { %18 = vsyncpa [#allocation8], 0  ;;  %s38_s19 = sshll.u32 %s3469_s2, 4  ;;  %s2322_s20 = smov [#allocation4]   ;;  %s39_s19 = int_to_ptr.hbm [resolvable:$true] %s38_s19 }
   0x3   :  { %s40_s21 = sshll.u32 %s2322_s20, 4  ;;  %s25_s24 = sshll.u32 %s3468_s1, 4  ;;  %s41_s21 = int_to_ptr.vmem [resolvable:$true] %s40_s21  ;;  %s26_s24 = int_to_ptr.hbm [resolvable:$true] %s25_s24 }
   0x4   :  { %s2323_s25 = smov 128   ;;  %s2324_s26 = smov 8  }
   0x5   :  { %46 = dma.hbm_to_vmem [thread:$0]  %s39_s19, 2304, %s41_s21, [#allocation5], %s2323_s25, %s2323_s25, %s2324_s26  }
   0x6   :  { %s2325_s27 = smov [#allocation2]   ;;  %s53_s12 = sshll.u32 %s3471_s4, 4  ;;  %s54_s12 = int_to_ptr.hbm [resolvable:$true] %s53_s12 }
   0x7   :  { %s27_s28 = sshll.u32 %s2325_s27, 4  ;;  %s66_s14 = sshll.u32 %s3472_s5, 4  ;;  %s28_s28 = int_to_ptr.vmem [resolvable:$true] %s27_s28  ;;  %s67_s14 = int_to_ptr.hbm [resolvable:$true] %s66_s14 }
   0x8   :  { %33 = dma.hbm_to_vmem [thread:$0]  %s26_s24, 2304, %s28_s28, [#allocation3], %s2323_s25, %s2323_s25, %s2324_s26  }
   0x9   :  { %s2326_s15 = smov [#allocation6]   ;;  %s2327_s1 = smov [#allocation7]  }
   0xa   :  { %s55_s16 = sshll.u32 %s2326_s15, 4  ;;  %s68_s17 = sshll.u32 %s2327_s1, 4  ;;  %s56_s16 = int_to_ptr.vmem [resolvable:$true] %s55_s16  ;;  %s69_s17 = int_to_ptr.vmem [resolvable:$true] %s68_s17 }
   0xb   :  { %61 = dma.hbm_to_vmem [thread:$0]  %s54_s12, 9600, %s56_s16, [#allocation5], %s2323_s25, %s2323_s25, %s2324_s26  }
   0xc   :  { %74 = dma.hbm_to_vmem [thread:$0]  %s67_s14, 9600, %s69_s17, [#allocation8], %s2323_s25, %s2323_s25, %s2324_s26  }
   0xd   :  { %2316 = dma.done.wait [#allocation3], 2304  }
   0xe   :  { %2317 = vsyncadd [#allocation3], 4294964992 }
   0xf   :  { %2318 = dma.done.wait [#allocation5], 11904  }
  0x10   :  { %2319 = vsyncadd [#allocation5], 4294955392 }
  0x11   :  { %2320 = dma.done.wait [#allocation8], 9600  }
  0x12   :  { %2321 = vsyncadd [#allocation8], 4294957696  ;;  %v2412_v0 = vld [vmem:[%s3467_s0 + $0x18] sm:$0xff]  ;;  %v2417_v1 = vld [vmem:[%s3467_s0 + $0x20] sm:$0xff]  ;;  %s2328_s26 = smov 112   ;;  %s2329_s27 = smov 84  }
  0x13   :  { %v2422_v2 = vld [vmem:[%s3467_s0 + $0x8] sm:$0xff]  ;;  %v2062_v3 = vpack.i.bf16 %v2417_v1, %v2412_v0  ;;  %v2429_v4 = vld [vmem:[%s3467_s0 + $0x10] sm:$0xff]  ;;  %s2330_s28 = smov 28   ;;  %s2331_s29 = smov 56   ;;  %v2464_v11 = vld [vmem:[%s3467_s0 + $0x38] sm:$0xff]  ;;  %vm615_vm0 = vcmask 1043456  }
  0x14   :  { %v2434_v5 = vld [vmem:[%s3467_s0 + $0x28] sm:$0xff]  ;;  %v2052_v6 = vpack.i.bf16 %v2429_v4, %v2422_v2  ;;  %v2057_v7 = vpack.i.bf16 %v2412_v0, %v2429_v4  ;;  %v2451_v8 = vld [vmem:[%s3467_s0 + $0x30] sm:$0xff]  ;;  %v2475_v13 = vld [vmem:[%s3467_s0 + $0x40] sm:$0xff]  ;;  %vm566_vm1 = vcmask 97280   ;;  %vm444_vm2 = vcmask 228352   ;;  %s2333_s16 = smov 96  }
  0x15   :  { %374 = vrot.lane.b32.xlu2 %v2434_v5, %s2328_s26  ;;  %2063 = vrot.lane.b32.xlu1 %v2062_v3, %s2329_s27  ;;  %v2077_v9 = vpack.i.bf16 %v2451_v8, %v2434_v5  ;;  %v2072_v10 = vpack.i.bf16 %v2434_v5, %v2417_v1  ;;  %v2087_v12 = vpack.i.bf16 %v2464_v11, %v2451_v8  ;;  %v2482_v15 = vld [vmem:[%s3467_s0 + $0x48] sm:$0xff]  ;;  %v2492_v16 = vld [vmem:[%s3467_s0 + $0x50] sm:$0xff]  ;;  %v560_v19 = vld [vmem:[#allocation2 + $0x78] sm:$0xff]  ;;  %vm469_vm3 = vcmask 457728   ;;  %s2334_s1 = smov 104   ;;  %s2336_s2 = smov 32  }
  0x16   :  { %2053 = vrot.lane.b32.xlu0 %v2052_v6, %s2330_s28  ;;  %v2092_v14 = vpack.i.bf16 %v2475_v13, %v2464_v11  ;;  %v2107_v17 = vpack.i.bf16 %v2492_v16, %v2482_v15  ;;  %v2102_v18 = vpack.i.bf16 %v2482_v15, %v2475_v13  ;;  %v812_v20 = vld [vmem:[#allocation4 + $0x78] sm:$0xff]  ;;  %619 = vmatpush.msra.mxu0 %v560_v19  ;;  %v2504_v21 = vld [vmem:[%s3467_s0 + $0x58] sm:$0xff]  ;;  %v2512_v22 = vld [vmem:[%s3467_s0 + $0x60] sm:$0xff]  ;;  %vm494_vm4 = vcmask 687104  }
  0x17   :  { %818 = vmatpush.msra.mxu2 %v812_v20  ;;  %v559_v23 = vld [vmem:[#allocation2 + $0x70] sm:$0xff]  ;;  %v811_v24 = vld [vmem:[#allocation4 + $0x70] sm:$0xff]  ;;  %v558_v25 = vld [vmem:[#allocation2 + $0x68] sm:$0xff]  ;;  %v2122_v29 = vpack.i.bf16 %v2512_v22, %v2504_v21  ;;  %v2117_v30 = vpack.i.bf16 %v2504_v21, %v2492_v16  ;;  %vm519_vm5 = vcmask 916480   ;;  %vm1151_vm6 = vcmask 982016  }
  0x18   :  { %620 = vmatpush.msra.mxu0 %v559_v23  ;;  %v810_v26 = vld [vmem:[#allocation4 + $0x68] sm:$0xff]  ;;  %v557_v27 = vld [vmem:[#allocation2 + $0x60] sm:$0xff]  ;;  %v809_v28 = vld [vmem:[#allocation4 + $0x60] sm:$0xff]  ;;  %vm1168_vm7 = vcmask 850944   ;;  %vm1177_vm8 = vcmask 785408   ;;  %vm1265_vm9 = vcmask 719872  }
  0x19   :  { %819 = vmatpush.msra.mxu2 %v811_v24  ;;  %v556_v31 = vld [vmem:[#allocation2 + $0x58] sm:$0xff]  ;;  %v808_v32 = vld [vmem:[#allocation4 + $0x58] sm:$0xff]  ;;  %v555_v33 = vld [vmem:[#allocation2 + $0x50] sm:$0xff]  ;;  %vm1795_vm10 = vcmask 654336   ;;  %vm1844_vm11 = vcmask 523264   ;;  %vm1797_vm12 = vcmask 261120  }
  0x1a   :  { %621 = vmatpush.msra.mxu0 %v558_v25  ;;  %v807_v34 = vld [vmem:[#allocation4 + $0x50] sm:$0xff]  ;;  %v554_v35 = vld [vmem:[#allocation2 + $0x48] sm:$0xff]  ;;  %v806_v37 = vld [vmem:[#allocation4 + $0x48] sm:$0xff]  ;;  %vm1923_vm13 = vcmask 1041408   ;;  %vm1919_vm14 = vcmask 408576   ;;  %vm1947_vm15 = vcmask 80896  }
  0x1b   :  { %820 = vmatpush.msra.mxu2 %v810_v26  ;;  %v2527_v36 = vld [vmem:[%s3467_s0 + $0x68] sm:$0xff]  ;;  %v553_v39 = vld [vmem:[#allocation2 + $0x40] sm:$0xff]  ;;  %v805_v40 = vld [vmem:[#allocation4 + $0x40] sm:$0xff] }
  0x1c   :  { %622 = vmatpush.msra.mxu0 %v557_v27  ;;  %v2132_v38 = vpack.i.bf16 %v2527_v36, %v2512_v22  ;;  %v552_v41 = vld [vmem:[#allocation2 + $0x38] sm:$0xff]  ;;  %v804_v42 = vld [vmem:[#allocation4 + $0x38] sm:$0xff]  ;;  %v2538_v43 = vld [vmem:[%s3467_s0 + $0x70] sm:$0xff] }
  0x1d   :  { %2068 = vrot.lane.b32.xlu2 %v2062_v3, %s2330_s28  ;;  %372 = vrot.lane.b32.xlu1 %v2417_v1, %s2328_s26  ;;  %v2137_v44 = vpack.i.bf16 %v2538_v43, %v2527_v36  ;;  %v2545_v45 = vld [vmem:[%s3467_s0 + $0x78] sm:$0xff]  ;;  %v551_v47 = vld [vmem:[#allocation2 + $0x30] sm:$0xff]  ;;  %v803_v48 = vld [vmem:[#allocation4 + $0x30] sm:$0xff] }
  0x1e   :  { %2058 = vrot.lane.b32.xlu0 %v2057_v7, %s2331_s29  ;;  %821 = vmatpush.msra.mxu2 %v809_v28  ;;  %v2147_v46 = vpack.i.bf16 %v2545_v45, %v2538_v43  ;;  %v2559_v49 = vld [vmem:[%s3467_s0 + $0x88] sm:$0xff]  ;;  %v2564_v50 = vld [vmem:[%s3467_s0 + $0x80] sm:$0xff]  ;;  %v802_v52 = vld [vmem:[#allocation4 + $0x28] sm:$0xff] }
  0x1f   :  { %623 = vmatpush.msra.mxu0 %v556_v31  ;;  %v550_v51 = vld [vmem:[#allocation2 + $0x28] sm:$0xff]  ;;  %v549_v53 = vld [vmem:[#allocation2 + $0x20] sm:$0xff]  ;;  %v801_v54 = vld [vmem:[#allocation4 + $0x20] sm:$0xff] }
  0x20   :  { %822 = vmatpush.msra.mxu2 %v808_v32  ;;  %v562_v55 = vld [vmem:[#allocation2 + $0x88] sm:$0xf]  ;;  %v814_v56 = vld [vmem:[#allocation4 + $0x88] sm:$0xf]  ;;  %v561_v59 = vld [vmem:[#allocation2 + $0x80] sm:$0xff] }
  0x21   :  { %624 = vmatpush.msra.mxu0 %v555_v33  ;;  %1968 = vmatpush.msk.msra.mxu1 %vm615_vm0, %v562_v55  ;;  %v548_v57 = vld [vmem:[#allocation2 + $0x18] sm:$0xff]  ;;  %v800_v58 = vld [vmem:[#allocation4 + $0x18] sm:$0xff]  ;;  %v2573_v60 = vld [vmem:[%s3467_s0 + $0x90] sm:$0xff] }
  0x22   :  { %823 = vmatpush.msra.mxu2 %v807_v34  ;;  %v813_v61 = vld [vmem:[#allocation4 + $0x80] sm:$0xff]  ;;  %1993 = vmatpush.msk.msra.mxu3 %vm615_vm0, %v814_v56  ;;  %v799_v63 = vld [vmem:[#allocation4 + $0x10] sm:$0xff]  ;;  %v2167_v3 = vpack.i.bf16 %v2573_v60, %v2559_v49  ;;  %v546_v6 = vld [vmem:[#allocation2 + $0x8] sm:$0xff] }
  0x23   :  { %625 = vmatpush.msra.mxu0 %v554_v35  ;;  %723 = vmatpush.msra.mxu1 %v561_v59  ;;  %v547_v62 = vld [vmem:[#allocation2 + $0x10] sm:$0xff]  ;;  %v798_v7 = vld [vmem:[#allocation4 + $0x8] sm:$0xff]  ;;  %v101_v27 = vld [vmem:[%s3467_s0] sm:$0xff] }
  0x24   :  { %824 = vmatpush.msra.mxu2 %v806_v37  ;;  %922 = vmatpush.msra.mxu3 %v813_v61  ;;  %v2620_v35 = vld [vmem:[%s3467_s0 + $0xa8] sm:$0xff]  ;;  %v2649_v55 = vld [vmem:[%s3467_s0 + $0xb8] sm:$0xff] }
  0x25   :  { %376 = vrot.lane.b32.xlu2 %v2451_v8, %s2328_s26  ;;  %2078 = vrot.lane.b32.xlu1 %v2077_v9, %s2329_s27 }
  0x26   :  { %2073 = vrot.lane.b32.xlu0 %v2072_v10, %s2331_s29  ;;  %626 = vmatpush.msra.mxu0 %v553_v39  ;;  %v2162_v10 = vpack.i.bf16 %v2559_v49, %v2564_v50 }
  0x27   :  { %825 = vmatpush.msra.mxu2 %v805_v40  ;;  %v2629_v40 = vld [vmem:[%s3467_s0 + $0xb0] sm:$0xff] }
  0x28   :  { %627 = vmatpush.msra.mxu0 %v552_v41 }
  0x29   :  { %826 = vmatpush.msra.mxu2 %v804_v42 }
  0x2a   :  { %628 = vmatpush.msra.mxu0 %v551_v47 }
  0x2b   :  { %827 = vmatpush.msra.mxu2 %v803_v48 }
  0x2c   :  { %629 = vmatpush.msra.mxu0 %v550_v51 }
  0x2d   :  { %2088 = vrot.lane.b32.xlu2 %v2087_v12, %s2331_s29  ;;  %2083 = vrot.lane.b32.xlu1 %v2077_v9, %s2330_s28  ;;  %v2152_v9 = vpack.i.bf16 %v2564_v50, %v2545_v45  ;;  %v545_v12 = vld [vmem:[#allocation2] sm:$0xff] }
  0x2e   :  { %378 = vrot.lane.b32.xlu0 %v2464_v11, %s2328_s26  ;;  %828 = vmatpush.msra.mxu2 %v802_v52 }
  0x2f   :  { %630 = vmatpush.msra.mxu0 %v549_v53 }
  0x30   :  { %829 = vmatpush.msra.mxu2 %v801_v54 }
  0x31   :  { %631 = vmatpush.msra.mxu0 %v548_v57 }
  0x32   :  { %830 = vmatpush.msra.mxu2 %v800_v58  ;;  %v2192_v58 = vpack.i.bf16 %v2629_v40, %v2620_v35 }
  0x33   :  { %632 = vmatpush.msra.mxu0 %v547_v62 }
  0x34   :  { %831 = vmatpush.msra.mxu2 %v799_v63 }
  0x35   :  { %382 = vrot.lane.b32.xlu2 %v2482_v15, %s2328_s26  ;;  %380 = vrot.lane.b32.xlu1 %v2475_v13, %s2328_s26 }
  0x36   :  { %2093 = vrot.lane.b32.xlu0 %v2092_v14, %s2329_s27  ;;  %633 = vmatpush.msra.mxu0 %v546_v6 }
  0x37   :  { %832 = vmatpush.msra.mxu2 %v798_v7 }
  0x38   :  { %634 = vmatpush.msra.mxu0 %v545_v12 }
  0x3d   :  { %2108 = vrot.lane.b32.xlu2 %v2107_v17, %s2329_s27  ;;  %2103 = vrot.lane.b32.xlu1 %v2102_v18, %s2331_s29  ;;  %v2596_v18 = vld [vmem:[%s3467_s0 + $0xa0] sm:$0xff] }
  0x3e   :  { %2098 = vrot.lane.b32.xlu0 %v2092_v14, %s2330_s28  ;;  %v797_v14 = vld [vmem:[#allocation4] sm:$0xff] }
  0x3f   :  { %833 = vmatpush.msra.mxu2 %v797_v14 }
  0x45   :  { %2113 = vrot.lane.b32.xlu2 %v2107_v17, %s2330_s28  ;;  %386 = vrot.lane.b32.xlu1 %v2504_v21, %s2328_s26  ;;  %v2587_v17 = vld [vmem:[%s3467_s0 + $0x98] sm:$0xff] }
  0x46   :  { %384 = vrot.lane.b32.xlu0 %v2492_v16, %s2328_s26  ;;  %v2182_v19 = vpack.i.bf16 %v2596_v18, %v2587_v17  ;;  %v2177_v25 = vpack.i.bf16 %v2587_v17, %v2573_v60 }
  0x4d   :  { %388 = vrot.lane.b32.xlu2 %v2512_v22, %s2328_s26  ;;  %2123 = vrot.lane.b32.xlu1 %v2122_v29, %s2329_s27 }
  0x4e   :  { %2118 = vrot.lane.b32.xlu0 %v2117_v30, %s2331_s29 }
  0x55   :  { %2133 = vrot.lane.b32.xlu2 %v2132_v38, %s2331_s29  ;;  %2128 = vrot.lane.b32.xlu1 %v2122_v29, %s2330_s28 }
  0x56   :  { %390 = vrot.lane.b32.xlu0 %v2527_v36, %s2328_s26 }
  0x5d   :  { %394 = vrot.lane.b32.xlu2 %v2545_v45, %s2328_s26  ;;  %392 = vrot.lane.b32.xlu1 %v2538_v43, %s2328_s26 }
  0x5e   :  { %2138 = vrot.lane.b32.xlu0 %v2137_v44, %s2329_s27 }
  0x65   :  { %2148 = vrot.lane.b32.xlu1 %v2147_v46, %s2331_s29  ;;  %2153 = vrot.lane.b32.xlu2 %v2152_v9, %s2329_s27 }
  0x66   :  { %2143 = vrot.lane.b32.xlu0 %v2137_v44, %s2330_s28 }
  0x6d   :  { %398 = vrot.lane.b32.xlu1 %v2559_v49, %s2328_s26  ;;  %2158 = vrot.lane.b32.xlu2 %v2152_v9, %s2330_s28  ;;  %v125_v9 = vld [vmem:[%s3467_s0 + $0xc0] sm:$0xff] }
  0x6e   :  { %396 = vrot.lane.b32.xlu0 %v2564_v50, %s2328_s26  ;;  %v2670_v12 = vpack.i.bf16 %v125_v9, %v2649_v55 }
  0x6f   :  { %v375_v20 = vpop.permute.xlu2 %374 }
  0x75   :  { %2168 = vrot.lane.b32.xlu1 %v2167_v3, %s2329_s27  ;;  %400 = vrot.lane.b32.xlu2 %v2573_v60, %s2328_s26 }
  0x76   :  { %2163 = vrot.lane.b32.xlu0 %v2162_v10, %s2331_s29 }
  0x77   :  { %v2069_v30 = vpop.permute.xlu2 %2068 }
  0x78   :  { %v2070_v47 = vunpack.i.l.bf16 %v2069_v30  ;;  %v2071_v61 = vunpack.i.h.bf16 %v2069_v30 }
  0x7a   :  { %v448_v6 = vsel %vm444_vm2, %v2412_v0, %v2071_v61 }
  0x7d   :  { %2173 = vrot.lane.b32.xlu1 %v2167_v3, %s2330_s28  ;;  %2178 = vrot.lane.b32.xlu2 %v2177_v25, %s2331_s29 }
  0x7e   :  { %402 = vrot.lane.b32.xlu0 %v2587_v17, %s2328_s26 }
  0x7f   :  { %v377_v53 = vpop.permute.xlu2 %376 }
  0x85   :  { %404 = vrot.lane.b32.xlu1 %v2596_v18, %s2328_s26  ;;  %406 = vrot.lane.b32.xlu2 %v2620_v35, %s2328_s26 }
  0x86   :  { %2183 = vrot.lane.b32.xlu0 %v2182_v19, %s2329_s27 }
  0x87   :  { %v2064_v23 = vpop.permute.xlu1 %2063  ;;  %v2089_v7 = vpop.permute.xlu2 %2088 }
  0x88   :  { %v2054_v24 = vpop.permute.xlu0 %2053  ;;  %v2065_v32 = vunpack.i.l.bf16 %v2064_v23  ;;  %v2066_v46 = vunpack.i.h.bf16 %v2064_v23  ;;  %v2090_v25 = vunpack.i.l.bf16 %v2089_v7 }
  0x89   :  { %v2055_v26 = vunpack.i.l.bf16 %v2054_v24  ;;  %v2056_v33 = vunpack.i.h.bf16 %v2054_v24 }
  0x8b   :  { %v445_v34 = vsel %vm444_vm2, %v101_v27, %v2055_v26  ;;  %v446_v42 = vsel %vm444_vm2, %v2422_v2, %v2056_v33  ;;  %v447_v2 = vsel %vm444_vm2, %v2429_v4, %v2070_v47  ;;  %v2197_v47 = vpack.i.bf16 %v2649_v55, %v2629_v40 }
  0x8d   :  { %262 = vrot.lane.b32.xlu1 %v2596_v18, %s2331_s29  ;;  %335 = vrot.lane.b32.xlu2 %v2620_v35, %s2329_s27 }
  0x8e   :  { %2188 = vrot.lane.b32.xlu0 %v2182_v19, %s2330_s28 }
  0x8f   :  { %v373_v28 = vpop.permute.xlu1 %372 }
  0x90   :  { %v2059_v29 = vpop.permute.xlu0 %2058  ;;  %1969 = vmatmul.msk.f32.vlgmr.msra.gmra.mxu1 %vm566_vm1, %v373_v28  ;;  %1994 = vmatmul.msk.f32.vlgmr.msra.gmra.mxu3 %vm566_vm1, %v373_v28 }
  0x91   :  { %v2060_v31 = vunpack.i.l.bf16 %v2059_v29  ;;  %v2061_v37 = vunpack.i.h.bf16 %v2059_v29  ;;  %v383_v29 = vpop.permute.xlu2 %382 }
  0x93   :  { %v470_v38 = vsel %vm469_vm3, %v445_v34, %v2060_v31  ;;  %v471_v44 = vsel %vm469_vm3, %v446_v42, %v2061_v37  ;;  %v2091_v34 = vunpack.i.h.bf16 %v2089_v7 }
  0x94   :  { %v495_v39 = vsel %vm494_vm4, %v470_v38, %v2065_v32  ;;  %v496_v52 = vsel %vm494_vm4, %v471_v44, %v2066_v46 }
  0x95   :  { %v520_v41 = vsel %vm519_vm5, %v495_v39, %v373_v28  ;;  %264 = vrot.lane.b32.xlu1 %v2620_v35, %s2331_s29  ;;  %v521_v56 = vsel %vm519_vm5, %v496_v52, %v375_v20  ;;  %337 = vrot.lane.b32.xlu2 %v2629_v40, %s2329_s27 }
  0x96   :  { %635 = vmatmul.f32.vlgmr.msra.gmra.mxu0 %v520_v41  ;;  %834 = vmatmul.f32.vlgmr.msra.gmra.mxu2 %v520_v41 }
  0x97   :  { %408 = vrot.lane.b32.xlu0 %v2629_v40, %s2328_s26  ;;  %v2079_v51 = vpop.permute.xlu1 %2078 }
  0x98   :  { %1970 = vmatmul.msk.f32.gmra.mxu1 %vm566_vm1, %v375_v20  ;;  %1995 = vmatmul.msk.f32.gmra.mxu3 %vm566_vm1, %v375_v20  ;;  %v2074_v48 = vpop.permute.xlu0 %2073  ;;  %v2080_v57 = vunpack.i.l.bf16 %v2079_v51  ;;  %v2081_v14 = vunpack.i.h.bf16 %v2079_v51 }
  0x99   :  { %v2075_v54 = vunpack.i.l.bf16 %v2074_v48  ;;  %v2076_v3 = vunpack.i.h.bf16 %v2074_v48  ;;  %v2109_v41 = vpop.permute.xlu2 %2108 }
  0x9b   :  { %v472_v59 = vsel %vm469_vm3, %v447_v2, %v2075_v54  ;;  %v473_v19 = vsel %vm469_vm3, %v448_v6, %v2076_v3  ;;  %v126_v3 = vld [vmem:[%s3467_s0 + $0xc8] sm:$0xff] }
  0x9c   :  { %v497_v63 = vsel %vm494_vm4, %v472_v59, %v2080_v57  ;;  %v498_v23 = vsel %vm494_vm4, %v473_v19, %v2081_v14 }
  0x9d   :  { %2193 = vrot.lane.b32.xlu1 %v2192_v58, %s2330_s28  ;;  %v522_v10 = vsel %vm519_vm5, %v497_v63, %v377_v53  ;;  %2198 = vrot.lane.b32.xlu2 %v2197_v47, %s2331_s29 }
  0x9e   :  { %638 = vmatmul.f32.gmra.mxu0 %v521_v56  ;;  %837 = vmatmul.f32.gmra.mxu2 %v521_v56 }
  0x9f   :  { %410 = vrot.lane.b32.xlu0 %v2649_v55, %s2328_s26  ;;  %v2084_v62 = vpop.permute.xlu1 %2083 }
  0xa0   :  { %v379_v4 = vpop.permute.xlu0 %378  ;;  %1971 = vmatmul.msk.f32.gmra.mxu1 %vm566_vm1, %v377_v53  ;;  %1996 = vmatmul.msk.f32.gmra.mxu3 %vm566_vm1, %v377_v53  ;;  %v2085_v20 = vunpack.i.l.bf16 %v2084_v62  ;;  %v2086_v31 = vunpack.i.h.bf16 %v2084_v62  ;;  %v2110_v53 = vunpack.i.l.bf16 %v2109_v41  ;;  %v2111_v62 = vunpack.i.h.bf16 %v2109_v41 }
  0xa1   :  { %v523_v27 = vsel %vm519_vm5, %v498_v23, %v379_v4  ;;  %v2114_v2 = vpop.permute.xlu2 %2113 }
  0xa2   :  { %v449_v26 = vsel %vm444_vm2, %v2417_v1, %v2085_v20  ;;  %v450_v1 = vsel %vm444_vm2, %v2434_v5, %v2086_v31  ;;  %v2115_v7 = vunpack.i.l.bf16 %v2114_v2 }
  0xa3   :  { %v474_v30 = vsel %vm469_vm3, %v449_v26, %v2090_v25  ;;  %v475_v42 = vsel %vm469_vm3, %v450_v1, %v2091_v34 }
  0xa4   :  { %v453_v19 = vsel %vm444_vm2, %v2475_v13, %v2115_v7 }
  0xa5   :  { %412 = vrot.lane.b32.xlu1 %v125_v9, %s2328_s26  ;;  %414 = vrot.lane.b32.xlu2 %v126_v3, %s2328_s26 }
  0xa6   :  { %641 = vmatmul.f32.gmra.mxu0 %v522_v10  ;;  %840 = vmatmul.f32.gmra.mxu2 %v522_v10 }
  0xa7   :  { %2203 = vrot.lane.b32.xlu0 %v2670_v12, %s2329_s27  ;;  %v381_v24 = vpop.permute.xlu1 %380 }
  0xa8   :  { %1972 = vmatmul.msk.f32.gmra.mxu1 %vm566_vm1, %v379_v4  ;;  %1997 = vmatmul.msk.f32.gmra.mxu3 %vm566_vm1, %v379_v4  ;;  %v2094_v0 = vpop.permute.xlu0 %2093 }
  0xa9   :  { %v2095_v28 = vunpack.i.l.bf16 %v2094_v0  ;;  %v2096_v39 = vunpack.i.h.bf16 %v2094_v0 }
  0xab   :  { %v499_v33 = vsel %vm494_vm4, %v474_v30, %v2095_v28  ;;  %v500_v5 = vsel %vm494_vm4, %v475_v42, %v2096_v39 }
  0xac   :  { %v524_v38 = vsel %vm519_vm5, %v499_v33, %v381_v24  ;;  %v525_v52 = vsel %vm519_vm5, %v500_v5, %v383_v29 }
  0xad   :  { %270 = vrot.lane.b32.xlu1 %v125_v9, %s2331_s29  ;;  %343 = vrot.lane.b32.xlu2 %v126_v3, %s2329_s27 }
  0xae   :  { %644 = vmatmul.f32.gmra.mxu0 %v523_v27  ;;  %843 = vmatmul.f32.gmra.mxu2 %v523_v27 }
  0xaf   :  { %v2104_v37 = vpop.permute.xlu1 %2103  ;;  %2208 = vrot.lane.b32.xlu0 %v2670_v12, %s2330_s28  ;;  %v2116_v12 = vunpack.i.h.bf16 %v2114_v2 }
  0xb0   :  { %1973 = vmatmul.msk.f32.gmra.mxu1 %vm566_vm1, %v381_v24  ;;  %1998 = vmatmul.msk.f32.gmra.mxu3 %vm566_vm1, %v381_v24  ;;  %v2099_v32 = vpop.permute.xlu0 %2098  ;;  %v2105_v48 = vunpack.i.l.bf16 %v2104_v37  ;;  %v2106_v61 = vunpack.i.h.bf16 %v2104_v37  ;;  %v127_v24 = vld [vmem:[%s3467_s0 + $0xd0] sm:$0xff] }
  0xb1   :  { %v2100_v44 = vunpack.i.l.bf16 %v2099_v32  ;;  %v2101_v57 = vunpack.i.h.bf16 %v2099_v32  ;;  %v128_v32 = vld [vmem:[%s3467_s0 + $0xd8] sm:$0xff] }
  0xb3   :  { %v451_v51 = vsel %vm444_vm2, %v2451_v8, %v2100_v44  ;;  %v452_v8 = vsel %vm444_vm2, %v2464_v11, %v2101_v57  ;;  %v389_v11 = vpop.permute.xlu2 %388 }
  0xb4   :  { %v476_v56 = vsel %vm469_vm3, %v451_v51, %v2105_v48  ;;  %v477_v6 = vsel %vm469_vm3, %v452_v8, %v2106_v61 }
  0xb5   :  { %v501_v59 = vsel %vm494_vm4, %v476_v56, %v2110_v53  ;;  %272 = vrot.lane.b32.xlu1 %v126_v3, %s2331_s29  ;;  %v502_v9 = vsel %vm494_vm4, %v477_v6, %v2111_v62  ;;  %345 = vrot.lane.b32.xlu2 %v127_v24, %s2329_s27 }
  0xb6   :  { %647 = vmatmul.f32.gmra.mxu0 %v524_v38  ;;  %846 = vmatmul.f32.gmra.mxu2 %v524_v38 }
  0xb7   :  { %v387_v54 = vpop.permute.xlu1 %386  ;;  %416 = vrot.lane.b32.xlu0 %v127_v24, %s2328_s26 }
  0xb8   :  { %1974 = vmatmul.msk.f32.gmra.mxu1 %vm566_vm1, %v383_v29  ;;  %1999 = vmatmul.msk.f32.gmra.mxu3 %vm566_vm1, %v383_v29  ;;  %v385_v46 = vpop.permute.xlu0 %384  ;;  %v527_v20 = vsel %vm519_vm5, %v502_v9, %v387_v54  ;;  %v454_v29 = vsel %vm444_vm2, %v2482_v15, %v2116_v12 }
  0xb9   :  { %v526_v4 = vsel %vm519_vm5, %v501_v59, %v385_v46 }
  0xbb   :  { %v2134_v26 = vpop.permute.xlu2 %2133 }
  0xbc   :  { %v2135_v37 = vunpack.i.l.bf16 %v2134_v26  ;;  %v2136_v51 = vunpack.i.h.bf16 %v2134_v26 }
  0xbe   :  { %650 = vmatmul.f32.gmra.mxu0 %v525_v52  ;;  %849 = vmatmul.f32.gmra.mxu2 %v525_v52 }
  0xbf   :  { %v2124_v63 = vpop.permute.xlu1 %2123  ;;  %418 = vrot.lane.b32.xlu0 %v128_v32, %s2328_s26 }
  0xc0   :  { %1975 = vmatmul.msk.f32.gmra.mxu1 %vm566_vm1, %v385_v46  ;;  %2000 = vmatmul.msk.f32.gmra.mxu3 %vm566_vm1, %v385_v46  ;;  %v2119_v58 = vpop.permute.xlu0 %2118  ;;  %v2125_v0 = vunpack.i.l.bf16 %v2124_v63  ;;  %v2126_v31 = vunpack.i.h.bf16 %v2124_v63 }
  0xc1   :  { %v2120_v10 = vunpack.i.l.bf16 %v2119_v58  ;;  %v2121_v27 = vunpack.i.h.bf16 %v2119_v58 }
  0xc3   :  { %v478_v25 = vsel %vm469_vm3, %v453_v19, %v2120_v10  ;;  %v479_v33 = vsel %vm469_vm3, %v454_v29, %v2121_v27  ;;  %v395_v41 = vpop.permute.xlu2 %394 }
  0xc4   :  { %v503_v13 = vsel %vm494_vm4, %v478_v25, %v2125_v0  ;;  %v504_v15 = vsel %vm494_vm4, %v479_v33, %v2126_v31 }
  0xc5   :  { %v528_v30 = vsel %vm519_vm5, %v503_v13, %v389_v11 }
  0xc6   :  { %653 = vmatmul.f32.gmra.mxu0 %v526_v4  ;;  %852 = vmatmul.f32.gmra.mxu2 %v526_v4 }
  0xc7   :  { %v2129_v23 = vpop.permute.xlu1 %2128 }
  0xc8   :  { %1976 = vmatmul.msk.f32.gmra.mxu1 %vm566_vm1, %v387_v54  ;;  %2001 = vmatmul.msk.f32.gmra.mxu3 %vm566_vm1, %v387_v54  ;;  %v391_v14 = vpop.permute.xlu0 %390  ;;  %v2130_v34 = vunpack.i.l.bf16 %v2129_v23  ;;  %v2131_v47 = vunpack.i.h.bf16 %v2129_v23 }
  0xc9   :  { %v529_v42 = vsel %vm519_vm5, %v504_v15, %v391_v14 }
  0xca   :  { %v455_v39 = vsel %vm444_vm2, %v2492_v16, %v2130_v34  ;;  %v456_v16 = vsel %vm444_vm2, %v2504_v21, %v2131_v47 }
  0xcb   :  { %v480_v46 = vsel %vm469_vm3, %v455_v39, %v2135_v37  ;;  %v2154_v52 = vpop.permute.xlu2 %2153  ;;  %v481_v56 = vsel %vm469_vm3, %v456_v16, %v2136_v51 }
  0xcc   :  { %v2155_v62 = vunpack.i.l.bf16 %v2154_v52 }
  0xce   :  { %656 = vmatmul.f32.gmra.mxu0 %v527_v20  ;;  %855 = vmatmul.f32.gmra.mxu2 %v527_v20 }
  0xcf   :  { %v393_v1 = vpop.permute.xlu1 %392 }
  0xd0   :  { %1977 = vmatmul.msk.f32.gmra.mxu1 %vm566_vm1, %v389_v11  ;;  %2002 = vmatmul.msk.f32.gmra.mxu3 %vm566_vm1, %v389_v11  ;;  %v2139_v28 = vpop.permute.xlu0 %2138 }
  0xd1   :  { %v2140_v44 = vunpack.i.l.bf16 %v2139_v28  ;;  %v2141_v2 = vunpack.i.h.bf16 %v2139_v28 }
  0xd3   :  { %v505_v5 = vsel %vm494_vm4, %v480_v46, %v2140_v44  ;;  %v506_v58 = vsel %vm494_vm4, %v481_v56, %v2141_v2  ;;  %v2159_v8 = vpop.permute.xlu2 %2158 }
  0xd4   :  { %v530_v53 = vsel %vm519_vm5, %v505_v5, %v393_v1  ;;  %v531_v4 = vsel %vm519_vm5, %v506_v58, %v395_v41  ;;  %v2160_v0 = vunpack.i.l.bf16 %v2159_v8  ;;  %v2161_v28 = vunpack.i.h.bf16 %v2159_v8 }
  0xd6   :  { %659 = vmatmul.f32.gmra.mxu0 %v528_v30  ;;  %858 = vmatmul.f32.gmra.mxu2 %v528_v30 }
  0xd7   :  { %v2149_v48 = vpop.permute.xlu1 %2148 }
  0xd8   :  { %1978 = vmatmul.msk.f32.gmra.mxu1 %vm566_vm1, %v391_v14  ;;  %2003 = vmatmul.msk.f32.gmra.mxu3 %vm566_vm1, %v391_v14  ;;  %v2144_v38 = vpop.permute.xlu0 %2143  ;;  %v2150_v59 = vunpack.i.l.bf16 %v2149_v48  ;;  %v2151_v11 = vunpack.i.h.bf16 %v2149_v48  ;;  %v2156_v14 = vunpack.i.h.bf16 %v2154_v52 }
  0xd9   :  { %v2145_v57 = vunpack.i.l.bf16 %v2144_v38  ;;  %v2146_v6 = vunpack.i.h.bf16 %v2144_v38 }
  0xdb   :  { %v457_v21 = vsel %vm444_vm2, %v2512_v22, %v2145_v57  ;;  %v458_v22 = vsel %vm444_vm2, %v2527_v36, %v2146_v6  ;;  %v401_v19 = vpop.permute.xlu2 %400  ;;  %v459_v36 = vsel %vm444_vm2, %v2538_v43, %v2160_v0  ;;  %v460_v43 = vsel %vm444_vm2, %v2545_v45, %v2161_v28  ;;  %v1201_v28 = vld [vmem:[#allocation6 + $0x70] sm:$0xff] }
  0xdc   :  { %v482_v63 = vsel %vm469_vm3, %v457_v21, %v2150_v59  ;;  %v483_v20 = vsel %vm469_vm3, %v458_v22, %v2151_v11  ;;  %v1218_v59 = vld [vmem:[#allocation6 + $0xf8] sm:$0xff] }
  0xdd   :  { %v507_v7 = vsel %vm494_vm4, %v482_v63, %v2155_v62  ;;  %v508_v24 = vsel %vm494_vm4, %v483_v20, %v2156_v14  ;;  %1323 = vmatpush.msrb.mxu3 %v1218_v59 }
  0xde   :  { %662 = vmatmul.f32.gmra.mxu0 %v529_v42  ;;  %861 = vmatmul.f32.gmra.mxu2 %v529_v42 }
  0xdf   :  { %v399_v61 = vpop.permute.xlu1 %398 }
  0xe0   :  { %1979 = vmatmul.msk.f32.gmra.mxu1 %vm566_vm1, %v393_v1  ;;  %2004 = vmatmul.msk.f32.gmra.mxu3 %vm566_vm1, %v393_v1  ;;  %v397_v54 = vpop.permute.xlu0 %396  ;;  %v533_v12 = vsel %vm519_vm5, %v508_v24, %v399_v61 }
  0xe1   :  { %v532_v10 = vsel %vm519_vm5, %v507_v7, %v397_v54 }
  0xe3   :  { %v2179_v29 = vpop.permute.xlu2 %2178 }
  0xe4   :  { %v2181_v52 = vunpack.i.h.bf16 %v2179_v29 }
  0xe6   :  { %665 = vmatmul.f32.gmra.mxu0 %v530_v53  ;;  %864 = vmatmul.f32.gmra.mxu2 %v530_v53 }
  0xe7   :  { %v2169_v9 = vpop.permute.xlu1 %2168 }
  0xe8   :  { %1980 = vmatmul.msk.f32.gmra.mxu1 %vm566_vm1, %v395_v41  ;;  %2005 = vmatmul.msk.f32.gmra.mxu3 %vm566_vm1, %v395_v41  ;;  %v2164_v3 = vpop.permute.xlu0 %2163  ;;  %v2170_v13 = vunpack.i.l.bf16 %v2169_v9  ;;  %v2171_v34 = vunpack.i.h.bf16 %v2169_v9  ;;  %v2180_v41 = vunpack.i.l.bf16 %v2179_v29  ;;  %v1202_v9 = vld [vmem:[#allocation6 + $0x78] sm:$0xff] }
  0xe9   :  { %v2165_v25 = vunpack.i.l.bf16 %v2164_v3  ;;  %v2166_v31 = vunpack.i.h.bf16 %v2164_v3  ;;  %1282 = vmatpush.msrb.mxu1 %v1202_v9 }
  0xeb   :  { %v484_v27 = vsel %vm469_vm3, %v459_v36, %v2165_v25  ;;  %v485_v1 = vsel %vm469_vm3, %v460_v43, %v2166_v31  ;;  %v407_v39 = vpop.permute.xlu2 %406  ;;  %1283 = vmatpush.msrb.mxu1 %v1201_v28 }
  0xec   :  { %v509_v30 = vsel %vm494_vm4, %v484_v27, %v2170_v13  ;;  %v510_v38 = vsel %vm494_vm4, %v485_v1, %v2171_v34  ;;  %v1217_v27 = vld [vmem:[#allocation6 + $0xf0] sm:$0xff]  ;;  %v2835_v1 = vld [vmem:[%s3470_s3] ss:$0 sm:$0xff]  ;;  %s2332_s3 = smov 120  }
  0xed   :  { %v534_v33 = vsel %vm519_vm5, %v509_v30, %v401_v19  ;;  %1324 = vmatpush.msrb.mxu3 %v1217_v27 }
  0xee   :  { %668 = vmatmul.f32.gmra.mxu0 %v531_v4  ;;  %867 = vmatmul.f32.gmra.mxu2 %v531_v4 }
  0xef   :  { %v2174_v26 = vpop.permute.xlu1 %2173 }
  0xf0   :  { %1981 = vmatmul.msk.f32.gmra.mxu1 %vm566_vm1, %v397_v54  ;;  %2006 = vmatmul.msk.f32.gmra.mxu3 %vm566_vm1, %v397_v54  ;;  %v403_v23 = vpop.permute.xlu0 %402  ;;  %v2175_v15 = vunpack.i.l.bf16 %v2174_v26  ;;  %v2176_v48 = vunpack.i.h.bf16 %v2174_v26 }
  0xf1   :  { %v535_v42 = vsel %vm519_vm5, %v510_v38, %v403_v23 }
  0xf2   :  { %v461_v45 = vsel %vm444_vm2, %v2564_v50, %v2175_v15  ;;  %v462_v54 = vsel %vm444_vm2, %v2559_v49, %v2176_v48 }
  0xf3   :  { %v486_v5 = vsel %vm469_vm3, %v461_v45, %v2180_v41  ;;  %v336_v2 = vpop.permute.xlu2 %335 }
  0xf6   :  { %671 = vmatmul.f32.gmra.mxu0 %v532_v10  ;;  %870 = vmatmul.f32.gmra.mxu2 %v532_v10 }
  0xf7   :  { %v405_v37 = vpop.permute.xlu1 %404 }
  0xf8   :  { %1982 = vmatmul.msk.f32.gmra.mxu1 %vm566_vm1, %v399_v61  ;;  %2007 = vmatmul.msk.f32.gmra.mxu3 %vm566_vm1, %v399_v61  ;;  %v2184_v32 = vpop.permute.xlu0 %2183  ;;  %v487_v61 = vsel %vm469_vm3, %v462_v54, %v2181_v52 }
  0xf9   :  { %v2185_v47 = vunpack.i.l.bf16 %v2184_v32  ;;  %v2186_v58 = vunpack.i.h.bf16 %v2184_v32 }
  0xfb   :  { %v511_v51 = vsel %vm494_vm4, %v486_v5, %v2185_v47  ;;  %v512_v49 = vsel %vm494_vm4, %v487_v61, %v2186_v58  ;;  %v338_v22 = vpop.permute.xlu2 %337 }
  0xfc   :  { %v536_v56 = vsel %vm519_vm5, %v511_v51, %v405_v37  ;;  %v537_v6 = vsel %vm519_vm5, %v512_v49, %v407_v39 }
  0xfe   :  { %674 = vmatmul.f32.gmra.mxu0 %v533_v12  ;;  %873 = vmatmul.f32.gmra.mxu2 %v533_v12 }
  0xff   :  { %v263_v16 = vpop.permute.xlu1 %262 }
 0x100   :  { %1983 = vmatmul.msk.f32.gmra.mxu1 %vm566_vm1, %v401_v19  ;;  %2008 = vmatmul.msk.f32.gmra.mxu3 %vm566_vm1, %v401_v19  ;;  %v2189_v46 = vpop.permute.xlu0 %2188 }
 0x101   :  { %v2190_v8 = vunpack.i.l.bf16 %v2189_v46  ;;  %v2191_v14 = vunpack.i.h.bf16 %v2189_v46 }
 0x103   :  { %v463_v3 = vsel %vm444_vm2, %v2573_v60, %v2190_v8  ;;  %v464_v24 = vsel %vm444_vm2, %v2587_v17, %v2191_v14  ;;  %v2199_v26 = vpop.permute.xlu2 %2198 }
 0x104   :  { %v488_v10 = vsel %vm469_vm3, %v463_v3, %v263_v16  ;;  %v2200_v17 = vunpack.i.l.bf16 %v2199_v26  ;;  %v2201_v51 = vunpack.i.h.bf16 %v2199_v26 }
 0x105   :  { %v513_v60 = vsel %vm494_vm4, %v488_v10, %v336_v2 }
 0x106   :  { %677 = vmatmul.f32.gmra.mxu0 %v534_v33  ;;  %876 = vmatmul.f32.gmra.mxu2 %v534_v33 }
 0x107   :  { %v265_v11 = vpop.permute.xlu1 %264 }
 0x108   :  { %1984 = vmatmul.msk.f32.gmra.mxu1 %vm566_vm1, %v403_v23  ;;  %2009 = vmatmul.msk.f32.gmra.mxu3 %vm566_vm1, %v403_v23  ;;  %v489_v29 = vsel %vm469_vm3, %v464_v24, %v265_v11 }
 0x109   :  { %v409_v21 = vpop.permute.xlu0 %408  ;;  %v514_v32 = vsel %vm494_vm4, %v489_v29, %v338_v22 }
 0x10a   :  { %v538_v25 = vsel %vm519_vm5, %v513_v60, %v409_v21 }
 0x10b   :  { %v415_v22 = vpop.permute.xlu2 %414 }
 0x10d   :  { %v2787_v44 = vpop.f32.mrf.mxu1 }
 0x10e   :  { %680 = vmatmul.f32.gmra.mxu0 %v535_v42  ;;  %879 = vmatmul.f32.gmra.mxu2 %v535_v42 }
 0x10f   :  { %v2194_v12 = vpop.permute.xlu1 %2193 }
 0x110   :  { %1985 = vmatmul.msk.f32.gmra.mxu1 %vm566_vm1, %v405_v37  ;;  %2010 = vmatmul.msk.f32.gmra.mxu3 %vm566_vm1, %v405_v37  ;;  %v2195_v13 = vunpack.i.l.bf16 %v2194_v12  ;;  %v2196_v45 = vunpack.i.h.bf16 %v2194_v12 }
 0x111   :  { %v411_v19 = vpop.permute.xlu0 %410 }
 0x112   :  { %v465_v43 = vsel %vm444_vm2, %v2596_v18, %v2195_v13  ;;  %v539_v37 = vsel %vm519_vm5, %v514_v32, %v411_v19  ;;  %v1216_v18 = vld [vmem:[#allocation6 + $0xe8] sm:$0xff]  ;;  %v466_v54 = vsel %vm444_vm2, %v2620_v35, %v2196_v45  ;;  %v1199_v13 = vld [vmem:[#allocation6 + $0x60] sm:$0xff] }
 0x113   :  { %v2793_v50 = vpop.f32.mrf.mxu0  ;;  %v2795_v53 = vpop.f32.mrf.mxu3  ;;  %1325 = vmatpush.msrb.mxu3 %v1216_v18  ;;  %v491_v3 = vsel %vm469_vm3, %v466_v54, %v2201_v51  ;;  %v1214_v51 = vld [vmem:[#allocation6 + $0xd8] sm:$0xff] }
 0x115   :  { %v2800_v57 = vpop.f32.mrf.mxu1 }
 0x116   :  { %683 = vmatmul.f32.gmra.mxu0 %v536_v56  ;;  %882 = vmatmul.f32.gmra.mxu2 %v536_v56 }
 0x117   :  { %v413_v42 = vpop.permute.xlu1 %412 }
 0x118   :  { %1986 = vmatmul.msk.f32.gmra.mxu1 %vm566_vm1, %v407_v39  ;;  %2011 = vmatmul.msk.f32.gmra.mxu3 %vm566_vm1, %v407_v39  ;;  %v490_v39 = vsel %vm469_vm3, %v465_v43, %v2200_v17 }
 0x119   :  { %v2805_v4 = vpop.f32.mrf.mxu2  ;;  %v2204_v31 = vpop.permute.xlu0 %2203 }
 0x11a   :  { %v2205_v15 = vunpack.i.l.bf16 %v2204_v31  ;;  %v2206_v8 = vunpack.i.h.bf16 %v2204_v31 }
 0x11b   :  { %v2808_v62 = vpop.f32.mrf.mxu0  ;;  %v2810_v63 = vpop.f32.mrf.mxu3 }
 0x11c   :  { %v515_v5 = vsel %vm494_vm4, %v490_v39, %v2205_v15  ;;  %v516_v35 = vsel %vm494_vm4, %v491_v3, %v2206_v8  ;;  %v344_v39 = vpop.permute.xlu2 %343  ;;  %v1198_v8 = vld [vmem:[#allocation6 + $0x58] sm:$0xff] }
 0x11d   :  { %v2815_v7 = vpop.f32.mrf.mxu1  ;;  %v540_v58 = vsel %vm519_vm5, %v515_v5, %v413_v42 }
 0x11e   :  { %686 = vmatmul.f32.gmra.mxu0 %v537_v6  ;;  %885 = vmatmul.f32.gmra.mxu2 %v537_v6 }
 0x11f   :  { %v271_v17 = vpop.permute.xlu1 %270 }
 0x120   :  { %1987 = vmatmul.msk.f32.gmra.mxu1 %vm566_vm1, %v409_v21  ;;  %2012 = vmatmul.msk.f32.gmra.mxu3 %vm566_vm1, %v409_v21 }
 0x121   :  { %v2820_v20 = vpop.f32.mrf.mxu2 }
 0x123   :  { %v642_v0 = vpop.f32.mrf.mxu0  ;;  %v930_v23 = vpop.f32.mrf.mxu3 }
 0x124   :  { %v643_v46 = vadd.f32 %v2835_v1, %v642_v0  ;;  %v541_v0 = vsel %vm519_vm5, %v516_v35, %v415_v22 }
 0x125   :  { %v734_v36 = vpop.f32.mrf.mxu1 }
 0x126   :  { %689 = vmatmul.f32.gmra.mxu0 %v538_v25  ;;  %888 = vmatmul.f32.gmra.mxu2 %v538_v25  ;;  %v732_v59 = vadd.f32 %v2815_v7, %v643_v46  ;;  %v1200_v7 = vld [vmem:[#allocation6 + $0x68] sm:$0xff] }
 0x127   :  { %1284 = vmatpush.msrb.mxu1 %v1200_v7 }
 0x128   :  { %1988 = vmatmul.msk.f32.gmra.mxu1 %vm566_vm1, %v411_v19  ;;  %2013 = vmatmul.msk.f32.gmra.mxu3 %vm566_vm1, %v411_v19 }
 0x129   :  { %v841_v30 = vpop.f32.mrf.mxu2  ;;  %1285 = vmatpush.msrb.mxu1 %v1199_v13 }
 0x12a   :  { %v842_v41 = vadd.f32 %v2835_v1, %v841_v30 }
 0x12b   :  { %v645_v33 = vpop.f32.mrf.mxu0  ;;  %v933_v34 = vpop.f32.mrf.mxu3  ;;  %1286 = vmatpush.msrb.mxu1 %v1198_v8  ;;  %v1195_v8 = vld [vmem:[#allocation6 + $0x40] sm:$0xff] }
 0x12c   :  { %v646_v47 = vadd.f32 %v2835_v1, %v645_v33  ;;  %v931_v16 = vadd.f32 %v930_v23, %v842_v41  ;;  %v2209_v23 = vpop.permute.xlu0 %2208 }
 0x12d   :  { %v2838_v38 = vpop.f32.mrf.mxu1  ;;  %v2210_v12 = vunpack.i.l.bf16 %v2209_v23 }
 0x12e   :  { %692 = vmatmul.f32.gmra.mxu0 %v539_v37  ;;  %891 = vmatmul.f32.gmra.mxu2 %v539_v37  ;;  %v735_v21 = vadd.f32 %v734_v36, %v646_v47  ;;  %v998_v6 = vmax.f32 %v732_v59, %v931_v16  ;;  %v1215_v36 = vld [vmem:[#allocation6 + $0xe0] sm:$0xff]  ;;  %v273_v16 = vpop.permute.xlu1 %272 }
 0x12f   :  { %1326 = vmatpush.msrb.mxu3 %v1215_v36  ;;  %v467_v31 = vsel %vm444_vm2, %v2629_v40, %v2210_v12  ;;  %v2211_v40 = vunpack.i.h.bf16 %v2209_v23 }
 0x130   :  { %2014 = vmatmul.msk.f32.gmra.mxu3 %vm566_vm1, %v413_v42  ;;  %1989 = vmatmul.msk.f32.gmra.mxu1 %vm566_vm1, %v413_v42  ;;  %v492_v33 = vsel %vm469_vm3, %v467_v31, %v271_v17  ;;  %v1234_v31 = vld [vmem:[#allocation6 + $0x178] sm:$0xff] }
 0x131   :  { %v844_v48 = vpop.f32.mrf.mxu2  ;;  %v517_v18 = vsel %vm494_vm4, %v492_v33, %v344_v39  ;;  %1327 = vmatpush.msrb.mxu3 %v1214_v51  ;;  %1364 = vmatpush.msrb.mxu0 %v1234_v31  ;;  %v1249_v33 = vld [vmem:[#allocation6 + $0x1f0] sm:$0xff] }
 0x132   :  { %v845_v52 = vadd.f32 %v2835_v1, %v844_v48 }
 0x133   :  { %v648_v2 = vpop.f32.mrf.mxu0  ;;  %v936_v56 = vpop.f32.mrf.mxu3 }
 0x134   :  { %v934_v61 = vadd.f32 %v933_v34, %v845_v52  ;;  %v649_v26 = vadd.f32 %v2835_v1, %v648_v2  ;;  %v417_v41 = vpop.permute.xlu0 %416  ;;  %v468_v52 = vsel %vm444_vm2, %v2649_v55, %v2211_v40 }
 0x135   :  { %v740_v49 = vpop.f32.mrf.mxu1  ;;  %v542_v47 = vsel %vm519_vm5, %v517_v18, %v417_v41 }
 0x136   :  { %v999_v11 = vmax.f32 %v735_v21, %v934_v61  ;;  %894 = vmatmul.f32.gmra.mxu2 %v540_v58  ;;  %695 = vmatmul.f32.gmra.mxu0 %v540_v58  ;;  %v738_v34 = vadd.f32 %v2838_v38, %v649_v26  ;;  %v346_v58 = vpop.permute.xlu2 %345 }
 0x138   :  { %v2853_v9 = vmax.f32 %v998_v6, %v999_v11  ;;  %2015 = vmatmul.msk.f32.gmra.mxu3 %vm566_vm1, %v415_v22  ;;  %1990 = vmatmul.msk.f32.gmra.mxu1 %vm566_vm1, %v415_v22 }
 0x139   :  { %v847_v10 = vpop.f32.mrf.mxu2 }
 0x13a   :  { %v1023_v14 = vmax.f32 %v2853_v9, 0.0  ;;  %v848_v25 = vadd.f32 %v2835_v1, %v847_v10 }
 0x13b   :  { %v651_v19 = vpop.f32.mrf.mxu0  ;;  %v939_v60 = vpop.f32.mrf.mxu3 }
 0x13c   :  { %1052 = vrot.lane.b32.xlu1 %v1023_v14, %s2332_s3  ;;  %v652_v27 = vadd.f32 %v2835_v1, %v651_v19  ;;  %v937_v29 = vadd.f32 %v936_v56, %v848_v25  ;;  %v493_v56 = vsel %vm469_vm3, %v468_v52, %v273_v16  ;;  %v419_v59 = vpop.permute.xlu0 %418 }
 0x13d   :  { %v2863_v24 = vpop.f32.mrf.mxu1  ;;  %v518_v61 = vsel %vm494_vm4, %v493_v56, %v346_v58 }
 0x13e   :  { %897 = vmatmul.f32.gmra.mxu2 %v541_v0  ;;  %698 = vmatmul.f32.gmra.mxu0 %v541_v0  ;;  %v741_v15 = vadd.f32 %v740_v49, %v652_v27  ;;  %v1000_v42 = vmax.f32 %v738_v34, %v937_v29  ;;  %v543_v49 = vsel %vm519_vm5, %v518_v61, %v419_v59  ;;  %v1213_v27 = vld [vmem:[#allocation6 + $0xd0] sm:$0xff]  ;;  %v1211_v61 = vld [vmem:[#allocation6 + $0xc0] sm:$0xff] }
 0x13f   :  { %v1197_v29 = vld [vmem:[#allocation6 + $0x50] sm:$0xff]  ;;  %1328 = vmatpush.msrb.mxu3 %v1213_v27 }
 0x140   :  { %2016 = vmatmul.msk.f32.gmra.mxu3 %vm566_vm1, %v417_v41  ;;  %1991 = vmatmul.msk.f32.gmra.mxu1 %vm566_vm1, %v417_v41 }
 0x141   :  { %v850_v28 = vpop.f32.mrf.mxu2  ;;  %1287 = vmatpush.msrb.mxu1 %v1197_v29  ;;  %v1247_v29 = vld [vmem:[#allocation6 + $0x1e0] sm:$0xff] }
 0x142   :  { %v851_v30 = vadd.f32 %v2835_v1, %v850_v28  ;;  %v1250_v28 = vld [vmem:[#allocation6 + $0x1f8] sm:$0xff] }
 0x143   :  { %v654_v32 = vpop.f32.mrf.mxu0  ;;  %v942_v43 = vpop.f32.mrf.mxu3  ;;  %1405 = vmatpush.msrb.mxu2 %v1250_v28  ;;  %v1210_v28 = vld [vmem:[#allocation6 + $0xb8] sm:$0xff] }
 0x144   :  { %v940_v37 = vadd.f32 %v939_v60, %v851_v30  ;;  %v655_v3 = vadd.f32 %v2835_v1, %v654_v32 }
 0x145   :  { %v746_v45 = vpop.f32.mrf.mxu1  ;;  %1406 = vmatpush.msrb.mxu2 %v1249_v33 }
 0x146   :  { %v1001_v46 = vmax.f32 %v741_v15, %v940_v37  ;;  %900 = vmatmul.f32.gmra.mxu2 %v542_v47  ;;  %701 = vmatmul.f32.gmra.mxu0 %v542_v47  ;;  %v744_v19 = vadd.f32 %v2863_v24, %v655_v3 }
 0x148   :  { %v1024_v5 = vmax.f32 %v1000_v42, %v1001_v46  ;;  %2017 = vmatmul.msk.f32.gmra.mxu3 %vm566_vm1, %v419_v59  ;;  %1992 = vmatmul.msk.f32.gmra.mxu1 %vm566_vm1, %v419_v59 }
 0x149   :  { %v853_v38 = vpop.f32.mrf.mxu2 }
 0x14a   :  { %v2877_v48 = vmax.f32 %v1024_v5, 0.0  ;;  %v854_v55 = vadd.f32 %v2835_v1, %v853_v38 }
 0x14b   :  { %v657_v54 = vpop.f32.mrf.mxu0  ;;  %v945_v2 = vpop.f32.mrf.mxu3 }
 0x14c   :  { %1054 = vrot.lane.b32.xlu0 %v2877_v48, %s2332_s3  ;;  %1077 = vrot.lane.b32.xlu2 %v2877_v48, %s2328_s26  ;;  %v658_v6 = vadd.f32 %v2835_v1, %v657_v54  ;;  %v943_v22 = vadd.f32 %v942_v43, %v854_v55  ;;  %v1212_v43 = vld [vmem:[#allocation6 + $0xc8] sm:$0xff] }
 0x14d   :  { %v749_v21 = vpop.f32.mrf.mxu1  ;;  %1329 = vmatpush.msrb.mxu3 %v1212_v43  ;;  %v1196_v54 = vld [vmem:[#allocation6 + $0x48] sm:$0xff]  ;;  %v1231_v43 = vld [vmem:[#allocation6 + $0x160] sm:$0xff] }
 0x14e   :  { %903 = vmatmul.f32.gmra.mxu2 %v543_v49  ;;  %704 = vmatmul.f32.gmra.mxu0 %v543_v49  ;;  %v747_v60 = vadd.f32 %v746_v45, %v658_v6  ;;  %v1002_v25 = vmax.f32 %v744_v19, %v943_v22  ;;  %v1248_v55 = vld [vmem:[#allocation6 + $0x1e8] sm:$0xff] }
 0x14f   :  { %1288 = vmatpush.msrb.mxu1 %v1196_v54  ;;  %1330 = vmatpush.msrb.mxu3 %v1211_v61  ;;  %v1232_v49 = vld [vmem:[#allocation6 + $0x168] sm:$0xff]  ;;  %v1191_v54 = vld [vmem:[#allocation6 + $0x20] sm:$0xff]  ;;  %v1230_v61 = vld [vmem:[#allocation6 + $0x158] sm:$0xff] }
 0x150   :  { %1407 = vmatpush.msrb.mxu2 %v1248_v55  ;;  %v1190_v55 = vld [vmem:[#allocation6 + $0x18] sm:$0xff] }
 0x151   :  { %v856_v11 = vpop.f32.mrf.mxu2  ;;  %1289 = vmatpush.msrb.mxu1 %v1195_v8  ;;  %1331 = vmatpush.msrb.mxu3 %v1210_v28 }
 0x152   :  { %v857_v35 = vadd.f32 %v2835_v1, %v856_v11  ;;  %1408 = vmatpush.msrb.mxu2 %v1247_v29 }
 0x153   :  { %v660_v7 = vpop.f32.mrf.mxu0  ;;  %v948_v10 = vpop.f32.mrf.mxu3 }
 0x154   :  { %v946_v0 = vadd.f32 %v945_v2, %v857_v35  ;;  %v661_v34 = vadd.f32 %v2835_v1, %v660_v7  ;;  %v1233_v2 = vld [vmem:[#allocation6 + $0x170] sm:$0xff] }
 0x155   :  { %v752_v23 = vpop.f32.mrf.mxu1  ;;  %1365 = vmatpush.msrb.mxu0 %v1233_v2  ;;  %v1207_v2 = vld [vmem:[#allocation6 + $0xa0] sm:$0xff] }
 0x156   :  { %v1003_v36 = vmax.f32 %v747_v60, %v946_v0  ;;  %v750_v42 = vadd.f32 %v749_v21, %v661_v34 }
 0x157   :  { %1366 = vmatpush.msrb.mxu0 %v1232_v49 }
 0x158   :  { %v1026_v12 = vmax.f32 %v1002_v25, %v1003_v36 }
 0x159   :  { %v859_v13 = vpop.f32.mrf.mxu2  ;;  %1367 = vmatpush.msrb.mxu0 %v1231_v43 }
 0x15a   :  { %v2895_v26 = vmax.f32 %v1026_v12, 0.0  ;;  %v860_v32 = vadd.f32 %v2835_v1, %v859_v13 }
 0x15b   :  { %v663_v30 = vpop.f32.mrf.mxu0  ;;  %v951_v17 = vpop.f32.mrf.mxu3  ;;  %1368 = vmatpush.msrb.mxu0 %v1230_v61 }
 0x15c   :  { %1056 = vrot.lane.b32.xlu2 %v2895_v26, %s2332_s3  ;;  %1079 = vrot.lane.b32.xlu1 %v2895_v26, %s2328_s26  ;;  %v664_v15 = vadd.f32 %v2835_v1, %v663_v30  ;;  %v949_v39 = vadd.f32 %v948_v10, %v860_v32  ;;  %v1194_v32 = vld [vmem:[#allocation6 + $0x38] sm:$0xff] }
 0x15d   :  { %v755_v24 = vpop.f32.mrf.mxu1  ;;  %1290 = vmatpush.msrb.mxu1 %v1194_v32 }
 0x15e   :  { %v753_v46 = vadd.f32 %v752_v23, %v664_v15  ;;  %v1004_v5 = vmax.f32 %v750_v42, %v949_v39 }
 0x161   :  { %v862_v37 = vpop.f32.mrf.mxu2 }
 0x162   :  { %v863_v41 = vadd.f32 %v2835_v1, %v862_v37 }
 0x163   :  { %v666_v45 = vpop.f32.mrf.mxu0  ;;  %v954_v18 = vpop.f32.mrf.mxu3 }
 0x164   :  { %v952_v40 = vadd.f32 %v951_v17, %v863_v41  ;;  %v667_v3 = vadd.f32 %v2835_v1, %v666_v45  ;;  %v1193_v41 = vld [vmem:[#allocation6 + $0x30] sm:$0xff] }
 0x165   :  { %v758_v47 = vpop.f32.mrf.mxu1  ;;  %v1209_v45 = vld [vmem:[#allocation6 + $0xb0] sm:$0xff]  ;;  %1291 = vmatpush.msrb.mxu1 %v1193_v41 }
 0x166   :  { %v1005_v38 = vmax.f32 %v753_v46, %v952_v40  ;;  %v756_v19 = vadd.f32 %v755_v24, %v667_v3  ;;  %1332 = vmatpush.msrb.mxu3 %v1209_v45  ;;  %v1189_v3 = vld [vmem:[#allocation6 + $0x10] sm:$0xff] }
 0x168   :  { %v1028_v51 = vmax.f32 %v1004_v5, %v1005_v38  ;;  %v1192_v5 = vld [vmem:[#allocation6 + $0x28] sm:$0xff] }
 0x169   :  { %v865_v16 = vpop.f32.mrf.mxu2  ;;  %v1208_v38 = vld [vmem:[#allocation6 + $0xa8] sm:$0xff]  ;;  %1292 = vmatpush.msrb.mxu1 %v1192_v5 }
 0x16a   :  { %v2905_v52 = vmax.f32 %v1028_v51, 0.0  ;;  %v866_v21 = vadd.f32 %v2835_v1, %v865_v16  ;;  %1333 = vmatpush.msrb.mxu3 %v1208_v38 }
 0x16b   :  { %v669_v56 = vpop.f32.mrf.mxu0  ;;  %v957_v58 = vpop.f32.mrf.mxu3  ;;  %1293 = vmatpush.msrb.mxu1 %v1191_v54 }
 0x16c   :  { %1081 = vrot.lane.b32.xlu0 %v2905_v52, %s2328_s26  ;;  %1058 = vrot.lane.b32.xlu1 %v2905_v52, %s2332_s3  ;;  %v670_v6 = vadd.f32 %v2835_v1, %v669_v56  ;;  %v955_v22 = vadd.f32 %v954_v18, %v866_v21  ;;  %v1246_v21 = vld [vmem:[#allocation6 + $0x1d8] sm:$0xff] }
 0x16d   :  { %v761_v59 = vpop.f32.mrf.mxu1  ;;  %1334 = vmatpush.msrb.mxu3 %v1207_v2  ;;  %1409 = vmatpush.msrb.mxu2 %v1246_v21 }
 0x16e   :  { %v759_v60 = vadd.f32 %v758_v47, %v670_v6  ;;  %v1006_v25 = vmax.f32 %v756_v19, %v955_v22  ;;  %1294 = vmatpush.msrb.mxu1 %v1190_v55  ;;  %v1205_v6 = vld [vmem:[#allocation6 + $0x90] sm:$0xff]  ;;  %v1187_v19 = vld [vmem:[#allocation6] sm:$0xff] }
 0x170   :  { %1295 = vmatpush.msrb.mxu1 %v1189_v3 }
 0x171   :  { %v868_v11 = vpop.f32.mrf.mxu2 }
 0x172   :  { %v869_v35 = vadd.f32 %v2835_v1, %v868_v11 }
 0x173   :  { %v672_v7 = vpop.f32.mrf.mxu0  ;;  %v960_v10 = vpop.f32.mrf.mxu3 }
 0x174   :  { %v958_v0 = vadd.f32 %v957_v58, %v869_v35  ;;  %v673_v33 = vadd.f32 %v2835_v1, %v672_v7  ;;  %v1188_v35 = vld [vmem:[#allocation6 + $0x8] sm:$0xff] }
 0x175   :  { %v764_v23 = vpop.f32.mrf.mxu1  ;;  %v1204_v7 = vld [vmem:[#allocation6 + $0x88] sm:$0xff]  ;;  %1296 = vmatpush.msrb.mxu1 %v1188_v35  ;;  %v1243_v35 = vld [vmem:[#allocation6 + $0x1c0] sm:$0xff] }
 0x176   :  { %v1007_v36 = vmax.f32 %v759_v60, %v958_v0  ;;  %v762_v46 = vadd.f32 %v761_v59, %v673_v33  ;;  %v1206_v59 = vld [vmem:[#allocation6 + $0x98] sm:$0xff]  ;;  %v1203_v60 = vld [vmem:[#allocation6 + $0x80] sm:$0xff] }
 0x177   :  { %1335 = vmatpush.msrb.mxu3 %v1206_v59  ;;  %1297 = vmatpush.msrb.mxu1 %v1187_v19 }
 0x178   :  { %v1030_v12 = vmax.f32 %v1006_v25, %v1007_v36  ;;  %v1245_v36 = vld [vmem:[#allocation6 + $0x1d0] sm:$0xff] }
 0x179   :  { %v871_v13 = vpop.f32.mrf.mxu2  ;;  %1336 = vmatpush.msrb.mxu3 %v1205_v6  ;;  %1410 = vmatpush.msrb.mxu2 %v1245_v36 }
 0x17a   :  { %v2915_v27 = vmax.f32 %v1030_v12, 0.0  ;;  %v872_v24 = vadd.f32 %v2835_v1, %v871_v13 }
 0x17b   :  { %v675_v30 = vpop.f32.mrf.mxu0  ;;  %v963_v17 = vpop.f32.mrf.mxu3  ;;  %1337 = vmatpush.msrb.mxu3 %v1204_v7  ;;  %v1227_v7 = vld [vmem:[#allocation6 + $0x140] sm:$0xff] }
 0x17c   :  { %1060 = vrot.lane.b32.xlu0 %v2915_v27, %s2332_s3  ;;  %1083 = vrot.lane.b32.xlu2 %v2915_v27, %s2328_s26  ;;  %v676_v34 = vadd.f32 %v2835_v1, %v675_v30  ;;  %v961_v37 = vadd.f32 %v960_v10, %v872_v24 }
 0x17d   :  { %v2921_v31 = vpop.f32.mrf.mxu1  ;;  %1338 = vmatpush.msrb.mxu3 %v1203_v60 }
 0x17e   :  { %v765_v40 = vadd.f32 %v764_v23, %v676_v34  ;;  %v1008_v51 = vmax.f32 %v762_v46, %v961_v37  ;;  %v1229_v34 = vld [vmem:[#allocation6 + $0x150] sm:$0xff] }
 0x17f   :  { %1369 = vmatpush.msrb.mxu0 %v1229_v34 }
 0x181   :  { %v874_v15 = vpop.f32.mrf.mxu2 }
 0x182   :  { %v875_v39 = vadd.f32 %v2835_v1, %v874_v15  ;;  %v1244_v15 = vld [vmem:[#allocation6 + $0x1c8] sm:$0xff] }
 0x183   :  { %v678_v18 = vpop.f32.mrf.mxu0  ;;  %v966_v42 = vpop.f32.mrf.mxu3  ;;  %1411 = vmatpush.msrb.mxu2 %v1244_v15 }
 0x184   :  { %v964_v47 = vadd.f32 %v963_v17, %v875_v39  ;;  %v679_v23 = vadd.f32 %v2835_v1, %v678_v18 }
 0x185   :  { %v770_v56 = vpop.f32.mrf.mxu1  ;;  %1412 = vmatpush.msrb.mxu2 %v1243_v35 }
 0x186   :  { %v1009_v16 = vmax.f32 %v765_v40, %v964_v47  ;;  %v768_v17 = vadd.f32 %v2921_v31, %v679_v23  ;;  %v839_v31 = vadd.f32 %v2835_v1, %v2820_v20  ;;  %v836_v40 = vadd.f32 %v2835_v1, %v2805_v4 }
 0x187   :  { %v640_v47 = vadd.f32 %v2835_v1, %v2808_v62 }
 0x188   :  { %v1032_v58 = vmax.f32 %v1008_v51, %v1009_v16  ;;  %v1228_v51 = vld [vmem:[#allocation6 + $0x148] sm:$0xff]  ;;  %v637_v16 = vadd.f32 %v2835_v1, %v2793_v50  ;;  %v928_v54 = vadd.f32 %v2810_v63, %v839_v31  ;;  %v925_v4 = vadd.f32 %v2795_v53, %v836_v40 }
 0x189   :  { %v877_v8 = vpop.f32.mrf.mxu2  ;;  %1370 = vmatpush.msrb.mxu0 %v1228_v51 }
 0x18a   :  { %v2927_v49 = vmax.f32 %v1032_v58, 0.0  ;;  %v878_v10 = vadd.f32 %v2835_v1, %v877_v8  ;;  %v729_v58 = vadd.f32 %v2800_v57, %v640_v47  ;;  %v726_v59 = vadd.f32 %v2787_v44, %v637_v16 }
 0x18b   :  { %v681_v11 = vpop.f32.mrf.mxu0  ;;  %v969_v22 = vpop.f32.mrf.mxu3  ;;  %1371 = vmatpush.msrb.mxu0 %v1227_v7 }
 0x18c   :  { %1062 = vrot.lane.b32.xlu2 %v2927_v49, %s2332_s3  ;;  %1085 = vrot.lane.b32.xlu1 %v2927_v49, %s2328_s26  ;;  %v682_v25 = vadd.f32 %v2835_v1, %v681_v11  ;;  %v967_v13 = vadd.f32 %v966_v42, %v878_v10  ;;  %v997_v3 = vmax.f32 %v729_v58, %v928_v54 }
 0x18d   :  { %v773_v0 = vpop.f32.mrf.mxu1  ;;  %v996_v11 = vmax.f32 %v726_v59, %v925_v4 }
 0x18e   :  { %v771_v24 = vadd.f32 %v770_v56, %v682_v25  ;;  %v1010_v43 = vmax.f32 %v768_v17, %v967_v13 }
 0x18f   :  { %v1020_v19 = vmax.f32 %v996_v11, %v997_v3 }
 0x191   :  { %v880_v12 = vpop.f32.mrf.mxu2  ;;  %v1021_v60 = vmax.f32 %v1020_v19, 0.0 }
 0x192   :  { %v881_v28 = vadd.f32 %v2835_v1, %v880_v12 }
 0x193   :  { %v684_v29 = vpop.f32.mrf.mxu0  ;;  %v972_v30 = vpop.f32.mrf.mxu3 }
 0x194   :  { %v970_v32 = vadd.f32 %v969_v22, %v881_v28  ;;  %v685_v5 = vadd.f32 %v2835_v1, %v684_v29 }
 0x195   :  { %v776_v39 = vpop.f32.mrf.mxu1 }
 0x196   :  { %v1011_v33 = vmax.f32 %v771_v24, %v970_v32  ;;  %v774_v61 = vadd.f32 %v773_v0, %v685_v5 }
 0x198   :  { %v1034_v37 = vmax.f32 %v1010_v43, %v1011_v33 }
 0x199   :  { %v883_v41 = vpop.f32.mrf.mxu2 }
 0x19a   :  { %v2938_v45 = vmax.f32 %v1034_v37, 0.0  ;;  %v884_v46 = vadd.f32 %v2835_v1, %v883_v41 }
 0x19b   :  { %v687_v18 = vpop.f32.mrf.mxu0  ;;  %v975_v42 = vpop.f32.mrf.mxu3 }
 0x19c   :  { %1087 = vrot.lane.b32.xlu0 %v2938_v45, %s2328_s26  ;;  %1064 = vrot.lane.b32.xlu1 %v2938_v45, %s2332_s3  ;;  %v688_v38 = vadd.f32 %v2835_v1, %v687_v18  ;;  %v973_v20 = vadd.f32 %v972_v30, %v884_v46  ;;  %v1242_v30 = vld [vmem:[#allocation6 + $0x1b8] sm:$0xff] }
 0x19d   :  { %v779_v62 = vpop.f32.mrf.mxu1  ;;  %1413 = vmatpush.msrb.mxu2 %v1242_v30  ;;  %v1226_v18 = vld [vmem:[#allocation6 + $0x138] sm:$0xff] }
 0x19e   :  { %v777_v55 = vadd.f32 %v776_v39, %v688_v38  ;;  %v1012_v6 = vmax.f32 %v774_v61, %v973_v20  ;;  %1372 = vmatpush.msrb.mxu0 %v1226_v18  ;;  %v1241_v20 = vld [vmem:[#allocation6 + $0x1b0] sm:$0xff] }
 0x19f   :  { %1414 = vmatpush.msrb.mxu2 %v1241_v20 }
 0x1a1   :  { %v886_v2 = vpop.f32.mrf.mxu2 }
 0x1a2   :  { %v887_v56 = vadd.f32 %v2835_v1, %v886_v2 }
 0x1a3   :  { %v690_v21 = vpop.f32.mrf.mxu0  ;;  %v978_v50 = vpop.f32.mrf.mxu3 }
 0x1a4   :  { %v976_v8 = vadd.f32 %v975_v42, %v887_v56  ;;  %v691_v28 = vadd.f32 %v2835_v1, %v690_v21  ;;  %v1225_v56 = vld [vmem:[#allocation6 + $0x130] sm:$0xff] }
 0x1a5   :  { %v782_v44 = vpop.f32.mrf.mxu1  ;;  %1373 = vmatpush.msrb.mxu0 %v1225_v56  ;;  %v1221_v56 = vld [vmem:[#allocation6 + $0x110] sm:$0xff] }
 0x1a6   :  { %v1013_v63 = vmax.f32 %v777_v55, %v976_v8  ;;  %v2966_v0 = vpop.permute.xlu2 %1077  ;;  %v780_v33 = vadd.f32 %v779_v62, %v691_v28 }
 0x1a8   :  { %v1036_v22 = vmax.f32 %v1012_v6, %v1013_v63  ;;  %v1240_v63 = vld [vmem:[#allocation6 + $0x1a8] sm:$0xff] }
 0x1a9   :  { %v889_v10 = vpop.f32.mrf.mxu2  ;;  %1415 = vmatpush.msrb.mxu2 %v1240_v63  ;;  %v1256_v63 = vld [vmem:[#allocation6 + $0x228] sm:$0xff] }
 0x1aa   :  { %v2960_v53 = vmax.f32 %v1036_v22, 0.0  ;;  %v890_v23 = vadd.f32 %v2835_v1, %v889_v10 }
 0x1ab   :  { %v693_v57 = vpop.f32.mrf.mxu0  ;;  %v981_v13 = vpop.f32.mrf.mxu3 }
 0x1ac   :  { %1066 = vrot.lane.b32.xlu0 %v2960_v53, %s2332_s3  ;;  %1089 = vrot.lane.b32.xlu2 %v2960_v53, %s2328_s26  ;;  %v694_v29 = vadd.f32 %v2835_v1, %v693_v57  ;;  %v979_v24 = vadd.f32 %v978_v50, %v890_v23 }
 0x1ad   :  { %v785_v41 = vpop.f32.mrf.mxu1 }
 0x1ae   :  { %v1053_v25 = vpop.permute.xlu1 %1052  ;;  %v783_v34 = vadd.f32 %v782_v44, %v694_v29  ;;  %v1014_v37 = vmax.f32 %v780_v33, %v979_v24  ;;  %v1224_v44 = vld [vmem:[#allocation6 + $0x128] sm:$0xff]  ;;  %v1239_v33 = vld [vmem:[#allocation6 + $0x1a0] sm:$0xff] }
 0x1af   :  { %v2970_v36 = vsel %vm1151_vm6, %v1021_v60, %v1053_v25  ;;  %v2974_v12 = vsel %vm519_vm5, %v1053_v25, %v2966_v0  ;;  %1374 = vmatpush.msrb.mxu0 %v1224_v44  ;;  %1416 = vmatpush.msrb.mxu2 %v1239_v33  ;;  %v1253_v44 = vld [vmem:[#allocation6 + $0x210] sm:$0xff] }
 0x1b0   :  { %1298 = vmatmul.f32.vlgmr.msrb.gmra.mxu1 %v2970_v36  ;;  %1339 = vmatmul.f32.vlgmr.msrb.gmra.mxu3 %v2974_v12 }
 0x1b1   :  { %v892_v17 = vpop.f32.mrf.mxu2 }
 0x1b2   :  { %v893_v32 = vadd.f32 %v2835_v1, %v892_v17 }
 0x1b3   :  { %v696_v43 = vpop.f32.mrf.mxu0  ;;  %v984_v42 = vpop.f32.mrf.mxu3 }
 0x1b4   :  { %v982_v15 = vadd.f32 %v981_v13, %v893_v32  ;;  %1127 = vrot.lane.b32.xlu0 %v2905_v52, %s2333_s16  ;;  %1102 = vrot.lane.b32.xlu2 %v2895_v26, %s2334_s1  ;;  %v697_v51 = vadd.f32 %v2835_v1, %v696_v43 }
 0x1b5   :  { %v788_v2 = vpop.f32.mrf.mxu1 }
 0x1b6   :  { %v1015_v39 = vmax.f32 %v783_v34, %v982_v15  ;;  %v786_v62 = vadd.f32 %v785_v41, %v697_v51  ;;  %v1502_v34 = vld [vmem:[#allocation7 + $0x78] sm:$0xff]  ;;  %v1223_v15 = vld [vmem:[#allocation6 + $0x120] sm:$0xff]  ;;  %v1499_v51 = vld [vmem:[#allocation7 + $0x60] sm:$0xff] }
 0x1b7   :  { %1562 = vmatpush.msra.mxu3 %v1502_v34  ;;  %1375 = vmatpush.msrb.mxu0 %v1223_v15  ;;  %v1488_v34 = vld [vmem:[#allocation7 + $0x8] sm:$0xff]  ;;  %v1487_v15 = vld [vmem:[#allocation7] sm:$0xff] }
 0x1b8   :  { %v1038_v31 = vmax.f32 %v1014_v37, %v1015_v39  ;;  %v1261_v37 = vld [vmem:[#allocation6 + $0x250] sm:$0xff]  ;;  %v1501_v39 = vld [vmem:[#allocation7 + $0x70] sm:$0xff] }
 0x1b9   :  { %v895_v46 = vpop.f32.mrf.mxu2  ;;  %1451 = vmatpush.msra.mxu1 %v1261_v37  ;;  %1563 = vmatpush.msra.mxu3 %v1501_v39  ;;  %v1533_v39 = vld [vmem:[#allocation7 + $0x170] sm:$0xff] }
 0x1ba   :  { %v2985_v40 = vmax.f32 %v1038_v31, 0.0  ;;  %v896_v16 = vadd.f32 %v2835_v1, %v895_v46 }
 0x1bb   :  { %v699_v47 = vpop.f32.mrf.mxu0  ;;  %v987_v58 = vpop.f32.mrf.mxu3 }
 0x1bc   :  { %1106 = vrot.lane.b32.xlu0 %v2915_v27, %s2334_s1  ;;  %1129 = vrot.lane.b32.xlu2 %v2915_v27, %s2333_s16  ;;  %v700_v54 = vadd.f32 %v2835_v1, %v699_v47  ;;  %v985_v21 = vadd.f32 %v984_v42, %v896_v16  ;;  %v1500_v47 = vld [vmem:[#allocation7 + $0x68] sm:$0xff]  ;;  %v1222_v16 = vld [vmem:[#allocation6 + $0x118] sm:$0xff] }
 0x1bd   :  { %1091 = vrot.lane.b32.xlu1 %v2985_v40, %s2328_s26  ;;  %v791_v6 = vpop.f32.mrf.mxu1  ;;  %1564 = vmatpush.msra.mxu3 %v1500_v47  ;;  %v1550_v47 = vld [vmem:[#allocation7 + $0x1f8] sm:$0xff] }
 0x1be   :  { %v1055_v5 = vpop.permute.xlu0 %1054  ;;  %v789_v61 = vadd.f32 %v788_v2, %v700_v54  ;;  %v1016_v59 = vmax.f32 %v786_v62, %v985_v21  ;;  %v1259_v54 = vld [vmem:[#allocation6 + $0x240] sm:$0xff]  ;;  %v1498_v2 = vld [vmem:[#allocation7 + $0x58] sm:$0xff]  ;;  %1376 = vmatpush.msrb.mxu0 %v1222_v16 }
 0x1bf   :  { %v2996_v38 = vsel %vm1151_vm6, %v1023_v14, %v1055_v5  ;;  %v1057_v14 = vpop.permute.xlu2 %1056  ;;  %1565 = vmatpush.msra.mxu3 %v1499_v51  ;;  %v1219_v21 = vld [vmem:[#allocation6 + $0x100] sm:$0xff] }
 0x1c0   :  { %1301 = vmatmul.f32.gmra.mxu1 %v2996_v38  ;;  %v3011_v8 = vsel %vm1151_vm6, %v2877_v48, %v1057_v14  ;;  %1377 = vmatpush.msrb.mxu0 %v1221_v56  ;;  %v1516_v16 = vld [vmem:[#allocation7 + $0xe8] sm:$0xff]  ;;  %v1515_v56 = vld [vmem:[#allocation7 + $0xe0] sm:$0xff] }
 0x1c1   :  { %v898_v4 = vpop.f32.mrf.mxu2  ;;  %1566 = vmatpush.msra.mxu3 %v1498_v2  ;;  %v1549_v2 = vld [vmem:[#allocation7 + $0x1f0] sm:$0xff] }
 0x1c2   :  { %v899_v9 = vadd.f32 %v2835_v1, %v898_v4  ;;  %v1497_v4 = vld [vmem:[#allocation7 + $0x50] sm:$0xff] }
 0x1c3   :  { %v702_v50 = vpop.f32.mrf.mxu0  ;;  %v990_v11 = vpop.f32.mrf.mxu3  ;;  %1567 = vmatpush.msra.mxu3 %v1497_v4  ;;  %v1530_v4 = vld [vmem:[#allocation7 + $0x158] sm:$0xff] }
 0x1c4   :  { %1133 = vrot.lane.b32.xlu0 %v2938_v45, %s2333_s16  ;;  %1108 = vrot.lane.b32.xlu2 %v2927_v49, %s2334_s1  ;;  %v988_v55 = vadd.f32 %v987_v58, %v899_v9  ;;  %v703_v48 = vadd.f32 %v2835_v1, %v702_v50  ;;  %v1220_v58 = vld [vmem:[#allocation6 + $0x108] sm:$0xff]  ;;  %v1258_v9 = vld [vmem:[#allocation6 + $0x238] sm:$0xff] }
 0x1c5   :  { %1104 = vrot.lane.b32.xlu1 %v2905_v52, %s2334_s1  ;;  %1378 = vmatpush.msrb.mxu0 %v1220_v58  ;;  %v1548_v58 = vld [vmem:[#allocation7 + $0x1e8] sm:$0xff] }
 0x1c6   :  { %v1017_v3 = vmax.f32 %v789_v61, %v988_v55  ;;  %v792_v23 = vadd.f32 %v791_v6, %v703_v48  ;;  %v1237_v61 = vld [vmem:[#allocation6 + $0x190] sm:$0xff]  ;;  %v1496_v55 = vld [vmem:[#allocation7 + $0x48] sm:$0xff] }
 0x1c7   :  { %1379 = vmatpush.msrb.mxu0 %v1219_v21  ;;  %1568 = vmatpush.msra.mxu3 %v1496_v55  ;;  %v1255_v48 = vld [vmem:[#allocation6 + $0x220] sm:$0xff]  ;;  %v1514_v21 = vld [vmem:[#allocation7 + $0xd8] sm:$0xff]  ;;  %v1547_v55 = vld [vmem:[#allocation7 + $0x1e0] sm:$0xff] }
 0x1c8   :  { %1304 = vmatmul.f32.gmra.mxu1 %v3011_v8  ;;  %v1040_v35 = vmax.f32 %v1016_v59, %v1017_v3  ;;  %v1257_v59 = vld [vmem:[#allocation6 + $0x230] sm:$0xff]  ;;  %v1495_v3 = vld [vmem:[#allocation7 + $0x40] sm:$0xff] }
 0x1c9   :  { %v901_v22 = vpop.f32.mrf.mxu2  ;;  %1569 = vmatpush.msra.mxu3 %v1495_v3  ;;  %v1513_v3 = vld [vmem:[#allocation7 + $0xd0] sm:$0xff] }
 0x1ca   :  { %v902_v7 = vadd.f32 %v2835_v1, %v901_v22  ;;  %v1041_v57 = vmax.f32 %v1040_v35, 0.0  ;;  %v1493_v22 = vld [vmem:[#allocation7 + $0x30] sm:$0xff] }
 0x1cb   :  { %v705_v60 = vpop.f32.mrf.mxu0  ;;  %v993_v29 = vpop.f32.mrf.mxu3 }
 0x1cc   :  { %1112 = vrot.lane.b32.xlu0 %v2960_v53, %s2334_s1  ;;  %1135 = vrot.lane.b32.xlu2 %v2960_v53, %s2333_s16  ;;  %v794_v53 = vpop.f32.mrf.mxu1  ;;  %v991_v25 = vadd.f32 %v990_v11, %v902_v7  ;;  %v706_v13 = vadd.f32 %v2835_v1, %v705_v60  ;;  %v1236_v11 = vld [vmem:[#allocation6 + $0x188] sm:$0xff]  ;;  %v1491_v60 = vld [vmem:[#allocation7 + $0x20] sm:$0xff] }
 0x1cd   :  { %1131 = vrot.lane.b32.xlu1 %v2927_v49, %s2333_s16 }
 0x1ce   :  { %v3022_v10 = vpop.permute.xlu1 %1079  ;;  %v795_v17 = vadd.f32 %v794_v53, %v706_v13  ;;  %v1018_v24 = vmax.f32 %v792_v23, %v991_v25  ;;  %v1252_v53 = vld [vmem:[#allocation6 + $0x208] sm:$0xff]  ;;  %v1235_v25 = vld [vmem:[#allocation6 + $0x180] sm:$0xff] }
 0x1cf   :  { %v3026_v19 = vsel %vm519_vm5, %v1055_v5, %v3022_v10  ;;  %v1260_v5 = vld [vmem:[#allocation6 + $0x248] sm:$0xff]  ;;  %v1251_v13 = vld [vmem:[#allocation6 + $0x200] sm:$0xff] }
 0x1d0   :  { %1342 = vmatmul.f32.gmra.mxu3 %v3026_v19  ;;  %1452 = vmatpush.msra.mxu1 %v1260_v5 }
 0x1d1   :  { %v904_v28 = vpop.f32.mrf.mxu2 }
 0x1d2   :  { %v905_v30 = vadd.f32 %v2835_v1, %v904_v28  ;;  %1453 = vmatpush.msra.mxu1 %v1259_v54  ;;  %v1490_v28 = vld [vmem:[#allocation7 + $0x18] sm:$0xff]  ;;  %v1531_v54 = vld [vmem:[#allocation7 + $0x160] sm:$0xff] }
 0x1d4   :  { %1139 = vrot.lane.b32.xlu0 %v1041_v57, %s2333_s16  ;;  %1114 = vrot.lane.b32.xlu2 %v2985_v40, %s2334_s1  ;;  %v994_v32 = vadd.f32 %v993_v29, %v905_v30  ;;  %v1489_v29 = vld [vmem:[#allocation7 + $0x10] sm:$0xff] }
 0x1d5   :  { %1110 = vrot.lane.b32.xlu1 %v2938_v45, %s2334_s1  ;;  %1454 = vmatpush.msra.mxu1 %v1258_v9  ;;  %v1559_v9 = vld [vmem:[#allocation7 + $0x240] sm:$0xff] }
 0x1d6   :  { %v1019_v43 = vmax.f32 %v795_v17, %v994_v32 }
 0x1d7   :  { %1455 = vmatpush.msra.mxu1 %v1257_v59  ;;  %v1558_v59 = vld [vmem:[#allocation7 + $0x238] sm:$0xff] }
 0x1d8   :  { %v1042_v1 = vmax.f32 %v1018_v24, %v1019_v43 }
 0x1d9   :  { %1456 = vmatpush.msra.mxu1 %v1256_v63 }
 0x1da   :  { %v1043_v41 = vmax.f32 %v1042_v1, 0.0  ;;  %v1561_v1 = vld [vmem:[#allocation7 + $0x250] sm:$0xff] }
 0x1db   :  { %1457 = vmatpush.msra.mxu1 %v1255_v48 }
 0x1dc   :  { %1141 = vrot.lane.b32.xlu2 %v1043_v41, %s2333_s16  ;;  %v1517_v41 = vld [vmem:[#allocation7 + $0xf0] sm:$0xff] }
 0x1dd   :  { %1137 = vrot.lane.b32.xlu1 %v2985_v40, %s2333_s16  ;;  %v1238_v40 = vld [vmem:[#allocation6 + $0x198] sm:$0xff] }
 0x1de   :  { %v3039_v18 = vpop.permute.xlu0 %1081  ;;  %v1059_v42 = vpop.permute.xlu1 %1058  ;;  %1417 = vmatpush.msrb.mxu2 %v1238_v40  ;;  %v1560_v40 = vld [vmem:[#allocation7 + $0x248] sm:$0xff] }
 0x1df   :  { %v3043_v31 = vsel %vm1151_vm6, %v2895_v26, %v1059_v42  ;;  %v3047_v46 = vsel %vm519_vm5, %v1057_v14, %v3039_v18  ;;  %v3052_v26 = vpop.permute.xlu2 %1083 }
 0x1e0   :  { %1307 = vmatmul.f32.gmra.mxu1 %v3043_v31  ;;  %1345 = vmatmul.f32.gmra.mxu3 %v3047_v46  ;;  %v3056_v20 = vsel %vm519_vm5, %v1059_v42, %v3052_v26  ;;  %v1532_v42 = vld [vmem:[#allocation7 + $0x168] sm:$0xff] }
 0x1e1   :  { %1418 = vmatpush.msrb.mxu2 %v1237_v61  ;;  %v1529_v61 = vld [vmem:[#allocation7 + $0x150] sm:$0xff] }
 0x1e3   :  { %1419 = vmatpush.msrb.mxu2 %v1236_v11  ;;  %v3119_v11 = vld [vmem:[%s3473_s6] ss:$0 sm:$0xff]  ;;  %s2335_s6 = smov 80  }
 0x1e5   :  { %1116 = vrot.lane.b32.xlu1 %v1041_v57, %s2334_s1  ;;  %v1254_v57 = vld [vmem:[#allocation6 + $0x218] sm:$0xff]  ;;  %1420 = vmatpush.msrb.mxu2 %v1235_v25 }
 0x1e6   :  { %1458 = vmatpush.msra.mxu1 %v1254_v57 }
 0x1e7   :  { %v1063_v50 = vpop.permute.xlu2 %1062 }
 0x1e8   :  { %1348 = vmatmul.f32.gmra.mxu3 %v3056_v20  ;;  %v3066_v6 = vsel %vm1151_vm6, %v2915_v27, %v1063_v50  ;;  %v1492_v27 = vld [vmem:[#allocation7 + $0x28] sm:$0xff]  ;;  %1459 = vmatpush.msra.mxu1 %v1253_v44 }
 0x1e9   :  { %v1512_v44 = vld [vmem:[#allocation7 + $0xc8] sm:$0xff] }
 0x1ea   :  { %1460 = vmatpush.msra.mxu1 %v1252_v53  ;;  %v1545_v53 = vld [vmem:[#allocation7 + $0x1d0] sm:$0xff] }
 0x1ec   :  { %1461 = vmatpush.msra.mxu1 %v1251_v13  ;;  %v1557_v13 = vld [vmem:[#allocation7 + $0x230] sm:$0xff] }
 0x1ee   :  { %v1061_v62 = vpop.permute.xlu0 %1060  ;;  %1685 = vmatpush.msrb.mxu1 %v1550_v47  ;;  %v1555_v47 = vld [vmem:[#allocation7 + $0x220] sm:$0xff] }
 0x1ef   :  { %v3061_v14 = vsel %vm1151_vm6, %v2905_v52, %v1061_v62  ;;  %v1494_v52 = vld [vmem:[#allocation7 + $0x38] sm:$0xff] }
 0x1f0   :  { %1310 = vmatmul.f32.gmra.mxu1 %v3061_v14  ;;  %1570 = vmatpush.msra.mxu3 %v1494_v52  ;;  %v1546_v52 = vld [vmem:[#allocation7 + $0x1d8] sm:$0xff] }
 0x1f1   :  { %1686 = vmatpush.msrb.mxu1 %v1549_v2  ;;  %v1508_v2 = vld [vmem:[#allocation7 + $0xa8] sm:$0xff] }
 0x1f2   :  { %1571 = vmatpush.msra.mxu3 %v1493_v22 }
 0x1f3   :  { %1687 = vmatpush.msrb.mxu1 %v1548_v58  ;;  %v1554_v58 = vld [vmem:[#allocation7 + $0x218] sm:$0xff] }
 0x1f4   :  { %1572 = vmatpush.msra.mxu3 %v1492_v27 }
 0x1f5   :  { %1688 = vmatpush.msrb.mxu1 %v1547_v55 }
 0x1f6   :  { %1573 = vmatpush.msra.mxu3 %v1491_v60  ;;  %v1527_v60 = vld [vmem:[#allocation7 + $0x140] sm:$0xff] }
 0x1f7   :  { %1689 = vmatpush.msrb.mxu1 %v1546_v52  ;;  %v1538_v52 = vld [vmem:[#allocation7 + $0x198] sm:$0xff] }
 0x1f8   :  { %1313 = vmatmul.f32.gmra.mxu1 %v3066_v6  ;;  %1574 = vmatpush.msra.mxu3 %v1490_v28 }
 0x1f9   :  { %1690 = vmatpush.msrb.mxu1 %v1545_v53  ;;  %v1520_v53 = vld [vmem:[#allocation7 + $0x108] sm:$0xff] }
 0x1fa   :  { %1575 = vmatpush.msra.mxu3 %v1489_v29  ;;  %v1511_v29 = vld [vmem:[#allocation7 + $0xc0] sm:$0xff] }
 0x1fc   :  { %1576 = vmatpush.msra.mxu3 %v1488_v34  ;;  %v1556_v34 = vld [vmem:[#allocation7 + $0x228] sm:$0xff] }
 0x1fe   :  { %v3069_v35 = vpop.permute.xlu1 %1085  ;;  %1577 = vmatpush.msra.mxu3 %v1487_v15 }
 0x1ff   :  { %v3073_v7 = vsel %vm519_vm5, %v1061_v62, %v3069_v35 }
 0x200   :  { %1351 = vmatmul.f32.gmra.mxu3 %v3073_v7 }
 0x201   :  { %1731 = vmatpush.msrb.mxu3 %v1561_v1  ;;  %v1525_v1 = vld [vmem:[#allocation7 + $0x130] sm:$0xff] }
 0x203   :  { %1732 = vmatpush.msrb.mxu3 %v1560_v40  ;;  %v1542_v40 = vld [vmem:[#allocation7 + $0x1b8] sm:$0xff] }
 0x205   :  { %1733 = vmatpush.msrb.mxu3 %v1559_v9  ;;  %v1522_v9 = vld [vmem:[#allocation7 + $0x118] sm:$0xff] }
 0x206   :  { %v3076_v23 = vpop.permute.xlu2 %1089 }
 0x207   :  { %1734 = vmatpush.msrb.mxu3 %v1558_v59  ;;  %v1539_v59 = vld [vmem:[#allocation7 + $0x1a0] sm:$0xff] }
 0x209   :  { %1735 = vmatpush.msrb.mxu3 %v1557_v13  ;;  %v1552_v13 = vld [vmem:[#allocation7 + $0x208] sm:$0xff] }
 0x20b   :  { %1736 = vmatpush.msrb.mxu3 %v1556_v34 }
 0x20d   :  { %1737 = vmatpush.msrb.mxu3 %v1555_v47 }
 0x20e   :  { %v3078_v30 = vpop.permute.xlu0 %1087  ;;  %v1103_v17 = vpop.permute.xlu2 %1102 }
 0x20f   :  { %v3082_v24 = vsel %vm1168_vm7, %v2966_v0, %v1103_v17  ;;  %v1065_v32 = vpop.permute.xlu1 %1064  ;;  %v3086_v43 = vsel %vm519_vm5, %v1063_v50, %v3078_v30  ;;  %v1534_v0 = vld [vmem:[#allocation7 + $0x178] sm:$0xff]  ;;  %v1528_v50 = vld [vmem:[#allocation7 + $0x148] sm:$0xff]  ;;  %1738 = vmatpush.msrb.mxu3 %v1554_v58 }
 0x210   :  { %v3090_v33 = vsel %vm1151_vm6, %v2927_v49, %v1065_v32  ;;  %1354 = vmatmul.f32.gmra.mxu3 %v3086_v43  ;;  %1380 = vmatmul.f32.vlgmr.msrb.gmra.mxu0 %v3082_v24  ;;  %v3097_v37 = vsel %vm519_vm5, %v1065_v32, %v3076_v23  ;;  %v1518_v49 = vld [vmem:[#allocation7 + $0xf8] sm:$0xff]  ;;  %v1544_v32 = vld [vmem:[#allocation7 + $0x1c8] sm:$0xff] }
 0x211   :  { %1316 = vmatmul.f32.gmra.mxu1 %v3090_v33  ;;  %1644 = vmatpush.msra.mxu2 %v1534_v0 }
 0x212   :  { %1603 = vmatpush.msra.mxu0 %v1518_v49  ;;  %1691 = vmatpush.msrb.mxu1 %v1544_v32  ;;  %v1519_v32 = vld [vmem:[#allocation7 + $0x100] sm:$0xff] }
 0x213   :  { %1645 = vmatpush.msra.mxu2 %v1533_v39  ;;  %v1510_v39 = vld [vmem:[#allocation7 + $0xb8] sm:$0xff] }
 0x214   :  { %1604 = vmatpush.msra.mxu0 %v1517_v41  ;;  %v1543_v41 = vld [vmem:[#allocation7 + $0x1c0] sm:$0xff] }
 0x215   :  { %1646 = vmatpush.msra.mxu2 %v1532_v42  ;;  %1692 = vmatpush.msrb.mxu1 %v1543_v41 }
 0x216   :  { %1605 = vmatpush.msra.mxu0 %v1516_v16  ;;  %v3114_v63 = vpop.permute.xlu2 %1129 }
 0x217   :  { %1647 = vmatpush.msra.mxu2 %v1531_v54  ;;  %1693 = vmatpush.msrb.mxu1 %v1542_v40 }
 0x218   :  { %1357 = vmatmul.f32.gmra.mxu3 %v3097_v37  ;;  %1606 = vmatpush.msra.mxu0 %v1515_v56  ;;  %v1523_v56 = vld [vmem:[#allocation7 + $0x120] sm:$0xff] }
 0x219   :  { %1648 = vmatpush.msra.mxu2 %v1530_v4  ;;  %v1541_v4 = vld [vmem:[#allocation7 + $0x1b0] sm:$0xff] }
 0x21a   :  { %1607 = vmatpush.msra.mxu0 %v1514_v21  ;;  %1694 = vmatpush.msrb.mxu1 %v1541_v4  ;;  %v1540_v21 = vld [vmem:[#allocation7 + $0x1a8] sm:$0xff] }
 0x21b   :  { %1649 = vmatpush.msra.mxu2 %v1529_v61 }
 0x21c   :  { %1608 = vmatpush.msra.mxu0 %v1513_v3  ;;  %1695 = vmatpush.msrb.mxu1 %v1540_v21 }
 0x21d   :  { %1650 = vmatpush.msra.mxu2 %v1528_v50  ;;  %v1553_v50 = vld [vmem:[#allocation7 + $0x210] sm:$0xff] }
 0x21e   :  { %v1067_v5 = vpop.permute.xlu0 %1066  ;;  %1609 = vmatpush.msra.mxu0 %v1512_v44  ;;  %v1109_v61 = vpop.permute.xlu2 %1108  ;;  %1696 = vmatpush.msrb.mxu1 %v1539_v59 }
 0x21f   :  { %v3102_v51 = vsel %vm1151_vm6, %v2938_v45, %v1067_v5  ;;  %1651 = vmatpush.msra.mxu2 %v1527_v60  ;;  %1739 = vmatpush.msrb.mxu3 %v1553_v50  ;;  %v1505_v60 = vld [vmem:[#allocation7 + $0x90] sm:$0xff] }
 0x220   :  { %1319 = vmatmul.f32.gmra.mxu1 %v3102_v51  ;;  %1610 = vmatpush.msra.mxu0 %v1511_v29 }
 0x221   :  { %1697 = vmatpush.msrb.mxu1 %v1538_v52  ;;  %1740 = vmatpush.msrb.mxu3 %v1552_v13 }
 0x222   :  { %1611 = vmatpush.msra.mxu0 %v1510_v39  ;;  %v1503_v39 = vld [vmem:[#allocation7 + $0x80] sm:$0xff] }
 0x226   :  { %v3105_v62 = vpop.permute.xlu0 %1127  ;;  %v3174_v29 = vpop.permute.xlu2 %1135 }
 0x227   :  { %v3109_v45 = vsel %vm1177_vm8, %v1103_v17, %v3105_v62  ;;  %v1526_v17 = vld [vmem:[#allocation7 + $0x138] sm:$0xff] }
 0x228   :  { %1421 = vmatmul.f32.vlgmr.msrb.gmra.mxu2 %v3109_v45  ;;  %2018 = vmatmul.msk.f32.vlgmr.msra.gmra.mxu1 %vm1265_vm9, %v3105_v62 }
 0x229   :  { %1652 = vmatpush.msra.mxu2 %v1526_v17 }
 0x22b   :  { %1653 = vmatpush.msra.mxu2 %v1525_v1  ;;  %v1535_v1 = vld [vmem:[#allocation7 + $0x180] sm:$0xff] }
 0x22d   :  { %v1299_v22 = vpop.f32.mrf.mxu1 }
 0x22e   :  { %v1300_v57 = vadd.f32 %v3119_v11, %v1299_v22  ;;  %v1107_v42 = vpop.permute.xlu0 %1106  ;;  %v1506_v22 = vld [vmem:[#allocation7 + $0x98] sm:$0xff] }
 0x22f   :  { %v3121_v48 = vpop.permute.xlu1 %1091 }
 0x230   :  { %v3125_v27 = vsel %vm519_vm5, %v1067_v5, %v3121_v48  ;;  %2019 = vmatmul.msk.f32.gmra.mxu1 %vm1265_vm9, %v3114_v63  ;;  %v1509_v5 = vld [vmem:[#allocation7 + $0xb0] sm:$0xff] }
 0x231   :  { %1360 = vmatmul.f32.gmra.mxu3 %v3125_v27  ;;  %1612 = vmatpush.msra.mxu0 %v1509_v5 }
 0x233   :  { %v1340_v25 = vpop.f32.mrf.mxu3  ;;  %1613 = vmatpush.msra.mxu0 %v1508_v2  ;;  %v1115_v2 = vpop.permute.xlu2 %1114 }
 0x234   :  { %v3131_v28 = vadd.f32 %v1340_v25, %v1300_v57  ;;  %v1521_v57 = vld [vmem:[#allocation7 + $0x110] sm:$0xff]  ;;  %v1504_v25 = vld [vmem:[#allocation7 + $0x88] sm:$0xff]  ;;  %v1175_v58 = vsel %vm1168_vm7, %v3076_v23, %v1115_v2 }
 0x236   :  { %v3159_v55 = vpop.permute.xlu0 %1133 }
 0x237   :  { %v1105_v15 = vpop.permute.xlu1 %1104  ;;  %v3169_v3 = vsel %vm1177_vm8, %v1109_v61, %v3159_v55 }
 0x238   :  { %v3135_v0 = vsel %vm1168_vm7, %v3022_v10, %v1105_v15  ;;  %v3139_v49 = vsel %vm1177_vm8, %v1105_v15, %v3114_v63  ;;  %v1524_v10 = vld [vmem:[#allocation7 + $0x128] sm:$0xff] }
 0x239   :  { %1383 = vmatmul.f32.gmra.mxu0 %v3135_v0  ;;  %1424 = vmatmul.f32.gmra.mxu2 %v3139_v49 }
 0x23a   :  { %1578 = vmatmul.f32.vlgmr.msra.gmra.mxu3 %v2970_v36  ;;  %1654 = vmatpush.msra.mxu2 %v1524_v10  ;;  %v3150_v36 = vsel %vm1168_vm7, %v3039_v18, %v1107_v42  ;;  %v1507_v18 = vld [vmem:[#allocation7 + $0xa0] sm:$0xff] }
 0x23b   :  { %1614 = vmatpush.msra.mxu0 %v1507_v18  ;;  %v3213_v21 = vpop.permute.xlu2 %1141 }
 0x23c   :  { %1655 = vmatpush.msra.mxu2 %v1523_v56 }
 0x23d   :  { %1615 = vmatpush.msra.mxu0 %v1506_v22  ;;  %v1302_v17 = vpop.f32.mrf.mxu1 }
 0x23e   :  { %1656 = vmatpush.msra.mxu2 %v1522_v9  ;;  %v1303_v41 = vadd.f32 %v3119_v11, %v1302_v17  ;;  %v1113_v47 = vpop.permute.xlu0 %1112 }
 0x23f   :  { %v3144_v16 = vpop.permute.xlu1 %1131  ;;  %1616 = vmatpush.msra.mxu0 %v1505_v60  ;;  %v1174_v40 = vsel %vm1168_vm7, %v3078_v30, %v1113_v47 }
 0x240   :  { %2020 = vmatmul.msk.f32.gmra.mxu1 %vm1265_vm9, %v3144_v16  ;;  %v3154_v54 = vsel %vm1177_vm8, %v1107_v42, %v3144_v16  ;;  %1657 = vmatpush.msra.mxu2 %v1521_v57  ;;  %v1551_v42 = vld [vmem:[#allocation7 + $0x200] sm:$0xff] }
 0x241   :  { %1386 = vmatmul.f32.gmra.mxu0 %v3150_v36  ;;  %1427 = vmatmul.f32.gmra.mxu2 %v3154_v54 }
 0x242   :  { %1581 = vmatmul.f32.gmra.mxu3 %v2996_v38  ;;  %v3165_v38 = vsel %vm1168_vm7, %v3052_v26, %v1109_v61  ;;  %v1537_v26 = vld [vmem:[#allocation7 + $0x190] sm:$0xff]  ;;  %1658 = vmatpush.msra.mxu2 %v1520_v53 }
 0x243   :  { %1698 = vmatpush.msrb.mxu1 %v1537_v26  ;;  %1617 = vmatpush.msra.mxu0 %v1504_v25 }
 0x244   :  { %1659 = vmatpush.msra.mxu2 %v1519_v32  ;;  %1741 = vmatpush.msrb.mxu3 %v1551_v42 }
 0x245   :  { %1618 = vmatpush.msra.mxu0 %v1503_v39  ;;  %v1305_v4 = vpop.f32.mrf.mxu1 }
 0x246   :  { %v3201_v56 = vpop.permute.xlu0 %1139  ;;  %v1306_v18 = vadd.f32 %v3119_v11, %v1305_v4 }
 0x247   :  { %v1111_v44 = vpop.permute.xlu1 %1110  ;;  %v1184_v30 = vsel %vm1177_vm8, %v1115_v2, %v3201_v56 }
 0x248   :  { %2021 = vmatmul.msk.f32.gmra.mxu1 %vm1265_vm9, %v3159_v55  ;;  %v3180_v34 = vsel %vm1168_vm7, %v3069_v35, %v1111_v44  ;;  %v3184_v15 = vsel %vm1177_vm8, %v1111_v44, %v3174_v29 }
 0x249   :  { %1389 = vmatmul.f32.gmra.mxu0 %v3165_v38  ;;  %1430 = vmatmul.f32.gmra.mxu2 %v3169_v3 }
 0x24a   :  { %1584 = vmatmul.f32.gmra.mxu3 %v3011_v8  ;;  %v1536_v8 = vld [vmem:[#allocation7 + $0x188] sm:$0xff] }
 0x24b   :  { %1699 = vmatpush.msrb.mxu1 %v1536_v8 }
 0x24d   :  { %1700 = vmatpush.msrb.mxu1 %v1535_v1 }
 0x24f   :  { %v3192_v10 = vpop.permute.xlu1 %1137 }
 0x250   :  { %2022 = vmatmul.msk.f32.gmra.mxu1 %vm1265_vm9, %v3174_v29 }
 0x251   :  { %1392 = vmatmul.f32.gmra.mxu0 %v3180_v34  ;;  %1433 = vmatmul.f32.gmra.mxu2 %v3184_v15 }
 0x252   :  { %1587 = vmatmul.f32.gmra.mxu3 %v3043_v31  ;;  %v1183_v31 = vsel %vm1177_vm8, %v1113_v47, %v3192_v10 }
 0x253   :  { %v1343_v35 = vpop.f32.mrf.mxu3 }
 0x254   :  { %v3190_v5 = vadd.f32 %v1343_v35, %v1303_v41 }
 0x257   :  { %v1117_v61 = vpop.permute.xlu1 %1116 }
 0x258   :  { %2023 = vmatmul.msk.f32.gmra.mxu1 %vm1265_vm9, %v3192_v10  ;;  %v1176_v23 = vsel %vm1168_vm7, %v3121_v48, %v1117_v61  ;;  %v1185_v50 = vsel %vm1177_vm8, %v1117_v61, %v3213_v21 }
 0x259   :  { %1395 = vmatmul.f32.gmra.mxu0 %v1174_v40  ;;  %1436 = vmatmul.f32.gmra.mxu2 %v1183_v31 }
 0x25a   :  { %1590 = vmatmul.f32.gmra.mxu3 %v3061_v14 }
 0x25d   :  { %v1308_v59 = vpop.f32.mrf.mxu1 }
 0x260   :  { %2024 = vmatmul.msk.f32.gmra.mxu1 %vm1265_vm9, %v3201_v56 }
 0x261   :  { %1398 = vmatmul.f32.gmra.mxu0 %v1175_v58  ;;  %1439 = vmatmul.f32.gmra.mxu2 %v1184_v30 }
 0x262   :  { %1593 = vmatmul.f32.gmra.mxu3 %v3066_v6  ;;  %v1309_v6 = vadd.f32 %v3119_v11, %v1308_v59 }
 0x263   :  { %v1346_v14 = vpop.f32.mrf.mxu3 }
 0x264   :  { %v3211_v9 = vadd.f32 %v1346_v14, %v1306_v18 }
 0x268   :  { %2025 = vmatmul.msk.f32.gmra.mxu1 %vm1265_vm9, %v3213_v21 }
 0x269   :  { %1401 = vmatmul.f32.gmra.mxu0 %v1176_v23  ;;  %1442 = vmatmul.f32.gmra.mxu2 %v1185_v50 }
 0x26a   :  { %1596 = vmatmul.f32.gmra.mxu3 %v3090_v33 }
 0x26b   :  { %v1349_v52 = vpop.f32.mrf.mxu3 }
 0x26c   :  { %v3223_v22 = vadd.f32 %v1349_v52, %v1309_v6 }
 0x26d   :  { %v1311_v33 = vpop.f32.mrf.mxu1 }
 0x270   :  { %1701 = vmatmul.f32.vlgmr.msrb.gmra.mxu1 %v3109_v45 }
 0x271   :  { %1619 = vmatmul.f32.vlgmr.msra.gmra.mxu0 %v2974_v12  ;;  %1660 = vmatmul.f32.vlgmr.msra.gmra.mxu2 %v3082_v24  ;;  %v1312_v12 = vadd.f32 %v3119_v11, %v1311_v33 }
 0x272   :  { %1599 = vmatmul.f32.gmra.mxu3 %v3102_v51 }
 0x278   :  { %1704 = vmatmul.f32.gmra.mxu1 %v3139_v49 }
 0x279   :  { %1622 = vmatmul.f32.gmra.mxu0 %v3026_v19  ;;  %1663 = vmatmul.f32.gmra.mxu2 %v3135_v0 }
 0x27a   :  { %2026 = vmatmul.msk.f32.vlgmr.msrb.gmra.mxu3 %vm1265_vm9, %v3105_v62  ;;  %v1314_v62 = vpop.f32.mrf.mxu1 }
 0x27b   :  { %v1315_v45 = vadd.f32 %v3119_v11, %v1314_v62 }
 0x280   :  { %1707 = vmatmul.f32.gmra.mxu1 %v3154_v54 }
 0x281   :  { %1625 = vmatmul.f32.gmra.mxu0 %v3047_v46  ;;  %1666 = vmatmul.f32.gmra.mxu2 %v3150_v36 }
 0x282   :  { %2027 = vmatmul.msk.f32.gmra.mxu3 %vm1265_vm9, %v3114_v63 }
 0x283   :  { %v1352_v24 = vpop.f32.mrf.mxu3 }
 0x284   :  { %v3240_v51 = vadd.f32 %v1352_v24, %v1312_v12 }
 0x288   :  { %1710 = vmatmul.f32.gmra.mxu1 %v3169_v3 }
 0x289   :  { %1628 = vmatmul.f32.gmra.mxu0 %v3056_v20  ;;  %1669 = vmatmul.f32.gmra.mxu2 %v3165_v38 }
 0x28a   :  { %2028 = vmatmul.msk.f32.gmra.mxu3 %vm1265_vm9, %v3144_v16 }
 0x28d   :  { %v1381_v19 = vpop.f32.mrf.mxu0 }
 0x28e   :  { %v1382_v46 = vadd.f32 %v1381_v19, %v3131_v28  ;;  %v1317_v48 = vpop.f32.mrf.mxu1 }
 0x28f   :  { %v1318_v28 = vadd.f32 %v3119_v11, %v1317_v48 }
 0x290   :  { %1713 = vmatmul.f32.gmra.mxu1 %v3184_v15 }
 0x291   :  { %1631 = vmatmul.f32.gmra.mxu0 %v3073_v7  ;;  %1672 = vmatmul.f32.gmra.mxu2 %v3180_v34 }
 0x292   :  { %2029 = vmatmul.msk.f32.gmra.mxu3 %vm1265_vm9, %v3159_v55 }
 0x293   :  { %v1355_v20 = vpop.f32.mrf.mxu3 }
 0x294   :  { %v1356_v63 = vadd.f32 %v1355_v20, %v1315_v45 }
 0x298   :  { %1716 = vmatmul.f32.gmra.mxu1 %v1183_v31 }
 0x299   :  { %1634 = vmatmul.f32.gmra.mxu0 %v3086_v43  ;;  %1675 = vmatmul.f32.gmra.mxu2 %v1174_v40 }
 0x29a   :  { %2030 = vmatmul.msk.f32.gmra.mxu3 %vm1265_vm9, %v3174_v29 }
 0x29b   :  { %v1358_v7 = vpop.f32.mrf.mxu3 }
 0x29c   :  { %v1359_v0 = vadd.f32 %v1358_v7, %v1318_v28 }
 0x29d   :  { %v1320_v49 = vpop.f32.mrf.mxu1 }
 0x2a0   :  { %1719 = vmatmul.f32.gmra.mxu1 %v1184_v30 }
 0x2a1   :  { %1637 = vmatmul.f32.gmra.mxu0 %v3097_v37  ;;  %1678 = vmatmul.f32.gmra.mxu2 %v1175_v58  ;;  %v1321_v37 = vadd.f32 %v3119_v11, %v1320_v49 }
 0x2a2   :  { %2031 = vmatmul.msk.f32.gmra.mxu3 %vm1265_vm9, %v3192_v10 }
 0x2a5   :  { %v1463_v43 = vpop.f32.mrf.mxu1 }
 0x2a8   :  { %1722 = vmatmul.f32.gmra.mxu1 %v1185_v50 }
 0x2a9   :  { %1640 = vmatmul.f32.gmra.mxu0 %v3125_v27  ;;  %1681 = vmatmul.f32.gmra.mxu2 %v1176_v23 }
 0x2aa   :  { %2032 = vmatmul.msk.f32.gmra.mxu3 %vm1265_vm9, %v3201_v56 }
 0x2ab   :  { %v1422_v16 = vpop.f32.mrf.mxu2 }
 0x2ac   :  { %v1423_v36 = vadd.f32 %v1422_v16, %v1382_v46 }
 0x2ad   :  { %v1466_v38 = vpop.f32.mrf.mxu1 }
 0x2ae   :  { %v3264_v54 = vadd.f32 %v1463_v43, %v1423_v36 }
 0x2b2   :  { %2033 = vmatmul.msk.f32.gmra.mxu3 %vm1265_vm9, %v3213_v21 }
 0x2b4   :  { %v1361_v55 = vpop.f32.mrf.mxu3 }
 0x2b5   :  { %v1362_v3 = vadd.f32 %v1361_v55, %v1321_v37 }
 0x2b6   :  { %v1384_v57 = vpop.f32.mrf.mxu0 }
 0x2b7   :  { %v1385_v27 = vadd.f32 %v1384_v57, %v3190_v5 }
 0x2bc   :  { %v1425_v44 = vpop.f32.mrf.mxu2 }
 0x2bd   :  { %v1426_v26 = vadd.f32 %v1425_v44, %v1385_v27  ;;  %v1579_v60 = vpop.f32.mrf.mxu3  ;;  %v1469_v53 = vpop.f32.mrf.mxu1 }
 0x2be   :  { %v1387_v25 = vpop.f32.mrf.mxu0  ;;  %v1580_v46 = vadd.f32 %v3119_v11, %v1579_v60 }
 0x2bf   :  { %v3270_v13 = vadd.f32 %v1466_v38, %v1426_v26  ;;  %v1388_v29 = vadd.f32 %v1387_v25, %v3211_v9 }
 0x2c4   :  { %v1428_v17 = vpop.f32.mrf.mxu2 }
 0x2c5   :  { %v1429_v8 = vadd.f32 %v1428_v17, %v1388_v29  ;;  %v1582_v32 = vpop.f32.mrf.mxu3  ;;  %v1472_v34 = vpop.f32.mrf.mxu1 }
 0x2c6   :  { %v1390_v15 = vpop.f32.mrf.mxu0 }
 0x2c7   :  { %v3273_v39 = vadd.f32 %v1469_v53, %v1429_v8  ;;  %v1391_v1 = vadd.f32 %v1390_v15, %v3223_v22 }
 0x2cc   :  { %v1431_v41 = vpop.f32.mrf.mxu2 }
 0x2cd   :  { %v1432_v42 = vadd.f32 %v1431_v41, %v1391_v1  ;;  %v1585_v47 = vpop.f32.mrf.mxu3  ;;  %v1475_v35 = vpop.f32.mrf.mxu1 }
 0x2ce   :  { %v1393_v5 = vpop.f32.mrf.mxu0  ;;  %v1586_v25 = vadd.f32 %v3119_v11, %v1585_v47 }
 0x2cf   :  { %v3276_v10 = vadd.f32 %v1472_v34, %v1432_v42  ;;  %v1394_v40 = vadd.f32 %v1393_v5, %v3240_v51 }
 0x2d4   :  { %v1434_v31 = vpop.f32.mrf.mxu2 }
 0x2d5   :  { %v1435_v2 = vadd.f32 %v1434_v31, %v1394_v40  ;;  %v1588_v56 = vpop.f32.mrf.mxu3  ;;  %v1478_v4 = vpop.f32.mrf.mxu1 }
 0x2d6   :  { %v1396_v58 = vpop.f32.mrf.mxu0 }
 0x2d7   :  { %v3279_v30 = vadd.f32 %v1475_v35, %v1435_v2  ;;  %v1397_v18 = vadd.f32 %v1396_v58, %v1356_v63  ;;  %v1589_v35 = vadd.f32 %v3119_v11, %v1588_v56 }
 0x2dc   :  { %v1437_v14 = vpop.f32.mrf.mxu2 }
 0x2dd   :  { %v1438_v9 = vadd.f32 %v1437_v14, %v1397_v18  ;;  %v1591_v21 = vpop.f32.mrf.mxu3  ;;  %v1481_v61 = vpop.f32.mrf.mxu1 }
 0x2de   :  { %v1399_v59 = vpop.f32.mrf.mxu0  ;;  %v1592_v18 = vadd.f32 %v3119_v11, %v1591_v21  ;;  %v1815_v21 = vld [vmem:[%s3474_s7 + $0x78] sm:$0xff] }
 0x2df   :  { %v3281_v23 = vadd.f32 %v1478_v4, %v1438_v9  ;;  %v1400_v50 = vadd.f32 %v1399_v59, %v1359_v0  ;;  %v1583_v0 = vadd.f32 %v3119_v11, %v1582_v32  ;;  %1847 = vmatpush.msrb.mxu0 %v1815_v21  ;;  %v1819_v21 = vld [vmem:[%s3474_s7 + $0x98] sm:$0xff] }
 0x2e4   :  { %v1440_v6 = vpop.f32.mrf.mxu2 }
 0x2e5   :  { %v1441_v52 = vadd.f32 %v1440_v6, %v1400_v50  ;;  %v1594_v22 = vpop.f32.mrf.mxu3  ;;  %v1484_v33 = vpop.f32.mrf.mxu1 }
 0x2e6   :  { %v1402_v12 = vpop.f32.mrf.mxu0 }
 0x2e7   :  { %v3283_v24 = vadd.f32 %v1481_v61, %v1441_v52  ;;  %v1403_v51 = vadd.f32 %v1402_v12, %v1362_v3  ;;  %v1595_v12 = vadd.f32 %v3119_v11, %v1594_v22 }
 0x2ec   :  { %v1443_v19 = vpop.f32.mrf.mxu2 }
 0x2ed   :  { %v1444_v62 = vadd.f32 %v1443_v19, %v1403_v51  ;;  %v3286_v45 = vpop.f32.mrf.mxu3  ;;  %v1702_v20 = vpop.f32.mrf.mxu1 }
 0x2ee   :  { %v1620_v63 = vpop.f32.mrf.mxu0 }
 0x2ef   :  { %v3288_v48 = vadd.f32 %v1484_v33, %v1444_v62  ;;  %v1621_v28 = vadd.f32 %v1620_v63, %v1580_v46  ;;  %v1831_v63 = vld [vmem:[%s3474_s7 + $0xf8] sm:$0xff] }
 0x2f0   :  { %1867 = vmatpush.msrb.mxu2 %v1831_v63  ;;  %v1835_v63 = vld [vmem:[%s3474_s7 + $0x118] sm:$0xff] }
 0x2f4   :  { %v1661_v7 = vpop.f32.mrf.mxu2 }
 0x2f5   :  { %v3291_v49 = vpop.f32.mrf.mxu3  ;;  %v1662_v43 = vadd.f32 %v1661_v7, %v1621_v28  ;;  %v1705_v36 = vpop.f32.mrf.mxu1  ;;  %v1830_v28 = vld [vmem:[%s3474_s7 + $0xf0] sm:$0xff] }
 0x2f6   :  { %v1623_v16 = vpop.f32.mrf.mxu0  ;;  %1868 = vmatpush.msrb.mxu2 %v1830_v28  ;;  %v1833_v28 = vld [vmem:[%s3474_s7 + $0x108] sm:$0xff] }
 0x2f7   :  { %v1624_v37 = vadd.f32 %v1623_v16, %v1583_v0  ;;  %v1703_v55 = vadd.f32 %v1702_v20, %v1662_v43  ;;  %v1813_v43 = vld [vmem:[%s3474_s7 + $0x68] sm:$0xff] }
 0x2f8   :  { %v1829_v16 = vld [vmem:[%s3474_s7 + $0xe8] sm:$0xff] }
 0x2f9   :  { %1869 = vmatpush.msrb.mxu2 %v1829_v16 }
 0x2fc   :  { %v1664_v38 = vpop.f32.mrf.mxu2 }
 0x2fd   :  { %v1665_v3 = vadd.f32 %v1664_v38, %v1624_v37  ;;  %v1743_v57 = vpop.f32.mrf.mxu3  ;;  %v1708_v53 = vpop.f32.mrf.mxu1  ;;  %v1812_v37 = vld [vmem:[%s3474_s7 + $0x60] sm:$0xff] }
 0x2fe   :  { %v1744_v27 = vadd.f32 %v1743_v57, %v1703_v55  ;;  %v1626_v44 = vpop.f32.mrf.mxu0  ;;  %v1828_v55 = vld [vmem:[%s3474_s7 + $0xe0] sm:$0xff]  ;;  %v1811_v57 = vld [vmem:[%s3474_s7 + $0x58] sm:$0xff] }
 0x2ff   :  { %v1706_v26 = vadd.f32 %v1705_v36, %v1665_v3  ;;  %v1627_v8 = vadd.f32 %v1626_v44, %v1586_v25  ;;  %1870 = vmatpush.msrb.mxu2 %v1828_v55 }
 0x300   :  { %v1767_v60 = vmax.f32 %v3264_v54, %v1744_v27  ;;  %v1827_v27 = vld [vmem:[%s3474_s7 + $0xd8] sm:$0xff] }
 0x301   :  { %1871 = vmatpush.msrb.mxu2 %v1827_v27  ;;  %v1912_v27 = vld [vmem:[%s3476_s9 + $0x20] sm:$0xff] }
 0x304   :  { %v1667_v29 = vpop.f32.mrf.mxu2 }
 0x305   :  { %v1746_v17 = vpop.f32.mrf.mxu3  ;;  %v1668_v15 = vadd.f32 %v1667_v29, %v1627_v8  ;;  %v1711_v42 = vpop.f32.mrf.mxu1  ;;  %v1825_v8 = vld [vmem:[%s3474_s7 + $0xc8] sm:$0xff] }
 0x306   :  { %v1747_v32 = vadd.f32 %v1746_v17, %v1706_v26  ;;  %v1629_v34 = vpop.f32.mrf.mxu0  ;;  %v1809_v17 = vld [vmem:[%s3474_s7 + $0x48] sm:$0xff] }
 0x307   :  { %v1709_v40 = vadd.f32 %v1708_v53, %v1668_v15  ;;  %v1630_v54 = vadd.f32 %v1629_v34, %v1589_v35  ;;  %v1810_v53 = vld [vmem:[%s3474_s7 + $0x50] sm:$0xff]  ;;  %v1808_v15 = vld [vmem:[%s3474_s7 + $0x40] sm:$0xff] }
 0x308   :  { %v1768_v1 = vmax.f32 %v3270_v13, %v1747_v32 }
 0x30a   :  { %v3296_v41 = vmax.f32 %v1767_v60, %v1768_v1 }
 0x30c   :  { %v1670_v5 = vpop.f32.mrf.mxu2  ;;  %v1776_v16 = vmax.f32 %v3296_v41, 0.0  ;;  %v1913_v41 = vld [vmem:[%s3476_s9 + $0x28] sm:$0xff] }
 0x30d   :  { %v1749_v31 = vpop.f32.mrf.mxu3  ;;  %v1671_v47 = vadd.f32 %v1670_v5, %v1630_v54  ;;  %v1714_v61 = vpop.f32.mrf.mxu1 }
 0x30e   :  { %v1750_v2 = vadd.f32 %v1749_v31, %v1709_v40  ;;  %v1632_v4 = vpop.f32.mrf.mxu0  ;;  %v1807_v40 = vld [vmem:[%s3474_s7 + $0x38] sm:$0xff] }
 0x30f   :  { %v1712_v9 = vadd.f32 %v1711_v42, %v1671_v47  ;;  %v1633_v59 = vadd.f32 %v1632_v4, %v1592_v18  ;;  %v1601_v42 = vadd.f32 %v3119_v11, %v3291_v49  ;;  %v1823_v31 = vld [vmem:[%s3474_s7 + $0xb8] sm:$0xff]  ;;  %v1822_v49 = vld [vmem:[%s3474_s7 + $0xb0] sm:$0xff] }
 0x310   :  { %v1769_v58 = vmax.f32 %v3273_v39, %v1750_v2 }
 0x314   :  { %v1673_v14 = vpop.f32.mrf.mxu2 }
 0x315   :  { %v1752_v13 = vpop.f32.mrf.mxu3  ;;  %v1674_v52 = vadd.f32 %v1673_v14, %v1633_v59  ;;  %v1717_v22 = vpop.f32.mrf.mxu1  ;;  %v1805_v14 = vld [vmem:[%s3474_s7 + $0x28] sm:$0xff] }
 0x316   :  { %v1753_v50 = vadd.f32 %v1752_v13, %v1712_v9  ;;  %v1635_v6 = vpop.f32.mrf.mxu0  ;;  %v1821_v9 = vld [vmem:[%s3474_s7 + $0xa8] sm:$0xff]  ;;  %v1820_v13 = vld [vmem:[%s3474_s7 + $0xa0] sm:$0xff] }
 0x317   :  { %v1715_v19 = vadd.f32 %v1714_v61, %v1674_v52  ;;  %v1636_v39 = vadd.f32 %v1635_v6, %v1595_v12  ;;  %v1804_v61 = vld [vmem:[%s3474_s7 + $0x20] sm:$0xff]  ;;  %v1801_v12 = vld [vmem:[%s3474_s7 + $0x8] sm:$0xff] }
 0x318   :  { %v1770_v56 = vmax.f32 %v3276_v10, %v1753_v50  ;;  %v1814_v10 = vld [vmem:[%s3474_s7 + $0x70] sm:$0xff]  ;;  %v1803_v50 = vld [vmem:[%s3474_s7 + $0x18] sm:$0xff] }
 0x319   :  { %1848 = vmatpush.msrb.mxu0 %v1814_v10  ;;  %v1834_v10 = vld [vmem:[%s3474_s7 + $0x110] sm:$0xff] }
 0x31a   :  { %v1777_v33 = vmax.f32 %v1769_v58, %v1770_v56  ;;  %v1802_v56 = vld [vmem:[%s3474_s7 + $0x10] sm:$0xff] }
 0x31b   :  { %1849 = vmatpush.msrb.mxu0 %v1813_v43  ;;  %v1816_v43 = vld [vmem:[%s3474_s7 + $0x80] sm:$0xff] }
 0x31c   :  { %v1676_v51 = vpop.f32.mrf.mxu2  ;;  %v1778_v46 = vmax.f32 %v1777_v33, 0.0 }
 0x31d   :  { %v1755_v62 = vpop.f32.mrf.mxu3  ;;  %v1677_v7 = vadd.f32 %v1676_v51, %v1636_v39  ;;  %1850 = vmatpush.msrb.mxu0 %v1812_v37  ;;  %v1720_v32 = vpop.f32.mrf.mxu1  ;;  %v1837_v39 = vld [vmem:[%s3474_s7 + $0x128] sm:$0xff] }
 0x31e   :  { %v1756_v20 = vadd.f32 %v1755_v62, %v1715_v19  ;;  %1784 = vrot.lane.b32.xlu0 %v1778_v46, %s2335_s6  ;;  %v1638_v36 = vpop.f32.mrf.mxu0  ;;  %v1800_v19 = vld [vmem:[%s3474_s7] sm:$0xff]  ;;  %v1839_v46 = vld [vmem:[%s3474_s7 + $0x138] sm:$0xff] }
 0x31f   :  { %v1718_v3 = vadd.f32 %v1717_v22, %v1677_v7  ;;  %1851 = vmatpush.msrb.mxu0 %v1811_v57  ;;  %v1818_v22 = vld [vmem:[%s3474_s7 + $0x90] sm:$0xff]  ;;  %v1832_v7 = vld [vmem:[%s3474_s7 + $0x100] sm:$0xff] }
 0x320   :  { %v1771_v0 = vmax.f32 %v3279_v30, %v1756_v20  ;;  %v1598_v30 = vadd.f32 %v3119_v11, %v3286_v45  ;;  %v1826_v45 = vld [vmem:[%s3474_s7 + $0xd0] sm:$0xff]  ;;  %v1836_v20 = vld [vmem:[%s3474_s7 + $0x120] sm:$0xff] }
 0x321   :  { %1852 = vmatpush.msrb.mxu0 %v1810_v53  ;;  %1872 = vmatpush.msrb.mxu2 %v1826_v45  ;;  %v1806_v11 = vld [vmem:[%s3474_s7 + $0x30] sm:$0xff]  ;;  %v1908_v53 = vld [vmem:[%s3476_s9] sm:$0xff] }
 0x322   :  { %v1639_v26 = vadd.f32 %v1638_v36, %v1598_v30  ;;  %v1914_v57 = vld [vmem:[%s3476_s9 + $0x30] sm:$0x3] }
 0x323   :  { %1853 = vmatpush.msrb.mxu0 %v1809_v17  ;;  %1873 = vmatpush.msrb.mxu2 %v1825_v8 }
 0x324   :  { %v1679_v38 = vpop.f32.mrf.mxu2 }
 0x325   :  { %v1758_v44 = vpop.f32.mrf.mxu3  ;;  %v1680_v25 = vadd.f32 %v1679_v38, %v1639_v26  ;;  %1854 = vmatpush.msrb.mxu0 %v1808_v15  ;;  %v1723_v59 = vpop.f32.mrf.mxu1  ;;  %v1910_v26 = vld [vmem:[%s3476_s9 + $0x10] sm:$0xff] }
 0x326   :  { %v1759_v60 = vadd.f32 %v1758_v44, %v1718_v3  ;;  %v1641_v1 = vpop.f32.mrf.mxu0  ;;  %v1911_v44 = vld [vmem:[%s3476_s9 + $0x18] sm:$0xff] }
 0x327   :  { %v1721_v35 = vadd.f32 %v1720_v32, %v1680_v25  ;;  %v1642_v4 = vadd.f32 %v1641_v1, %v1601_v42  ;;  %1855 = vmatpush.msrb.mxu0 %v1807_v40  ;;  %v2214_v25 = vld [vmem:[%s3475_s8] ss:$0 sm:$0xff] }
 0x328   :  { %v1772_v29 = vmax.f32 %v3281_v23, %v1759_v60  ;;  %v1824_v23 = vld [vmem:[%s3474_s7 + $0xc0] sm:$0xff]  ;;  %v1909_v60 = vld [vmem:[%s3476_s9 + $0x8] sm:$0xff] }
 0x329   :  { %1874 = vmatpush.msrb.mxu2 %v1824_v23  ;;  %1856 = vmatpush.msrb.mxu0 %v1806_v11  ;;  %v2215_v23 = vld [vmem:[%s3477_s10] ss:$0 sm:$0xff] }
 0x32a   :  { %v1779_v34 = vmax.f32 %v1771_v0, %v1772_v29  ;;  %v1817_v0 = vld [vmem:[%s3474_s7 + $0x88] sm:$0xff] }
 0x32b   :  { %1875 = vmatpush.msrb.mxu2 %v1823_v31  ;;  %1857 = vmatpush.msrb.mxu0 %v1805_v14 }
 0x32c   :  { %v1780_v5 = vmax.f32 %v1779_v34, 0.0  ;;  %v1682_v54 = vpop.f32.mrf.mxu2 }
 0x32d   :  { %v1761_v2 = vpop.f32.mrf.mxu3  ;;  %v1683_v58 = vadd.f32 %v1682_v54, %v1642_v4  ;;  %1876 = vmatpush.msrb.mxu2 %v1822_v49  ;;  %1858 = vmatpush.msrb.mxu0 %v1804_v61 }
 0x32e   :  { %v1762_v47 = vadd.f32 %v1761_v2, %v1721_v35  ;;  %1788 = vrot.lane.b32.xlu1 %v1780_v5, %s2336_s2 }
 0x32f   :  { %1877 = vmatpush.msrb.mxu2 %v1821_v9  ;;  %1859 = vmatpush.msrb.mxu0 %v1803_v50 }
 0x330   :  { %v1773_v18 = vmax.f32 %v3283_v24, %v1762_v47  ;;  %v1724_v24 = vadd.f32 %v1723_v59, %v1683_v58 }
 0x331   :  { %1878 = vmatpush.msrb.mxu2 %v1820_v13  ;;  %1860 = vmatpush.msrb.mxu0 %v1802_v56 }
 0x333   :  { %1861 = vmatpush.msrb.mxu0 %v1801_v12  ;;  %1879 = vmatpush.msrb.mxu2 %v1819_v21 }
 0x335   :  { %v1764_v6 = vpop.f32.mrf.mxu3  ;;  %1862 = vmatpush.msrb.mxu0 %v1800_v19  ;;  %1880 = vmatpush.msrb.mxu2 %v1818_v22 }
 0x336   :  { %v1765_v52 = vadd.f32 %v1764_v6, %v1724_v24 }
 0x337   :  { %1895 = vmatpush.msra.mxu0 %v1839_v46  ;;  %1881 = vmatpush.msrb.mxu2 %v1817_v0 }
 0x338   :  { %v1774_v33 = vmax.f32 %v3288_v48, %v1765_v52  ;;  %v1838_v48 = vld [vmem:[%s3474_s7 + $0x130] sm:$0xff] }
 0x339   :  { %1896 = vmatpush.msra.mxu0 %v1838_v48  ;;  %1882 = vmatpush.msrb.mxu2 %v1816_v43 }
 0x33a   :  { %v1781_v51 = vmax.f32 %v1773_v18, %v1774_v33 }
 0x33b   :  { %1897 = vmatpush.msra.mxu0 %v1837_v39  ;;  %2035 = vmatpush.msk.msra.mxu2 %vm1923_vm13, %v1914_v57 }
 0x33c   :  { %v1782_v62 = vmax.f32 %v1781_v51, 0.0 }
 0x33d   :  { %1898 = vmatpush.msra.mxu0 %v1836_v20  ;;  %1937 = vmatpush.msra.mxu2 %v1913_v41 }
 0x33e   :  { %1792 = vrot.lane.b32.xlu2 %v1782_v62, %s2328_s26 }
 0x33f   :  { %1899 = vmatpush.msra.mxu0 %v1835_v63  ;;  %1938 = vmatpush.msra.mxu2 %v1912_v27 }
 0x341   :  { %1900 = vmatpush.msra.mxu0 %v1834_v10  ;;  %1939 = vmatpush.msra.mxu2 %v1911_v44 }
 0x343   :  { %1901 = vmatpush.msra.mxu0 %v1833_v28  ;;  %1940 = vmatpush.msra.mxu2 %v1910_v26 }
 0x345   :  { %1902 = vmatpush.msra.mxu0 %v1832_v7  ;;  %1941 = vmatpush.msra.mxu2 %v1909_v60 }
 0x347   :  { %1942 = vmatpush.msra.mxu2 %v1908_v53 }
 0x390   :  { %v1785_v36 = vpop.permute.xlu0 %1784 }
 0x391   :  { %v1796_v37 = vsel %vm1795_vm10, %v1776_v16, %v1785_v36 }
 0x392   :  { %1863 = vmatmul.f32.vlgmr.msrb.gmra.mxu0 %v1796_v37 }
 0x398   :  { %v1793_v55 = vpop.permute.xlu2 %1792 }
 0x39a   :  { %2034 = vmatmul.msk.f32.vlgmr.msra.gmra.mxu0 %vm1844_vm11, %v1793_v55 }
 0x3a0   :  { %v1789_v30 = vpop.permute.xlu1 %1788 }
 0x3a1   :  { %v1798_v38 = vsel %vm1797_vm12, %v1785_v36, %v1789_v30 }
 0x3a2   :  { %v1799_v3 = vsel %vm519_vm5, %v1798_v38, %v1793_v55 }
 0x3a3   :  { %1883 = vmatmul.f32.vlgmr.msrb.gmra.mxu2 %v1799_v3 }
 0x40f   :  { %v1864_v45 = vpop.f32.mrf.mxu0 }
 0x410   :  { %v1865_v29 = vadd.f32 %v2214_v25, %v1864_v45 }
 0x417   :  { %v1904_v32 = vpop.f32.mrf.mxu0 }
 0x426   :  { %v1884_v17 = vpop.f32.mrf.mxu2 }
 0x427   :  { %v1885_v8 = vadd.f32 %v1884_v17, %v1865_v29 }
 0x429   :  { %v1905_v34 = vadd.f32 %v1904_v32, %v1885_v8 }
 0x42b   :  { %v1907_v15 = vmax.f32 %v1905_v34, 0.0 }
 0x42d   :  { %2036 = vmatmul.msk.f32.vlgmr.msra.gmra.mxu2 %vm1919_vm14, %v1907_v15 }
 0x4b0   :  { %v1944_v1 = vpop.f32.mrf.mxu2 }
 0x4b1   :  { %v1945_v42 = vadd.f32 %v2215_v23, %v1944_v1 }
 0x4b3   :  { %v1948_v35 = vsel %vm1947_vm15, %v1945_v42, -inf }
 0x4b4   :  { %1949 = vmax.xlane.f32.xlu0 %v1948_v35 }
 0x527   :  { %v1950_v5 = vpop.xlane.xlu0 %1949 }
 0x528   :  { %v1951_v40 = vsub.f32 %v1945_v42, %v1950_v5 }
 0x52a   :  { %v1952_v31 = vmul.f32 1.442695, %v1951_v40 }
 0x52c   :  { %2216 = vpow2.f32 %v1952_v31 }
 0x532   :  { %v2217_v54 = vpop.eup %2216 }
 0x533   :  { %v1954_v2 = vsel %vm1947_vm15, %v2217_v54, 0.0 }
 0x534   :  { %1955 = vadd.xlane.f32.xlu1 %v1954_v2 }
 0x5a7   :  { %v1956_v4 = vpop.xlane.xlu1 %1955 }
 0x5a8   :  { %2218 = vlog2.f32 %v1956_v4 }
 0x5ae   :  { %v2219_v47 = vpop.eup %2218 }
 0x5af   :  { %v1958_v11 = vmul.f32 0.6931472, %v2219_v47 }
 0x5b1   :  { %v1959_v49 = vsub.f32 %v1951_v40, %v1958_v11 }
 0x5b3   :  { %1960 = vst.msk [vmem:[%s3478_s11] sm:$0xff] %vm1947_vm15, %v1959_v49 }
 0x5b4   :  { %1965 = vsyncpa [#allocation3], 1 }
 0x5b5   :  { %1966 = vsyncpa [#allocation5], 1 }
 0x5b6   :  { %1967 = vsyncpa [#allocation8], 1 }

</bundles_post_ra>
